<compile_context>
chip_gen: v6e
topology: v6e:2x2x1
jax: 0.10.0
libtpu: 0.0.40
codegen_flags: <defaults>
</compile_context>

<pallas_src>
import math
import jax
import jax.numpy as jnp
from jax import lax
from jax.experimental import pallas as pl
from jax.experimental.pallas import tpu as pltpu

B, S, D, H = 2, 50, 32, 4
DH = D // H              # 8
P = 2 * D + H * D        # 192 packed projection width: [ q(32) | k(32) | vo(128) ]
EPS = 1e-5
SCALE = 1.0 / math.sqrt(8.0)
MASK_NEG = -1e30         # finite large-negative additive mask (no inf-inf NaNs)


def _multihead_kernel(qkv_ref, mask_ref, w_ref, vecs_ref, o_ref):
    """One batch item per grid step.

    qkv_ref : (1, 3, S, D) f32   [Q_b ; K_b ; V_b]
    mask_ref: (1, H, S, S) bf16  additive mask (0 / -1e30)
    w_ref   : (3D, P)      f32   block-diag( wq, wk, Wvo )
    vecs_ref: (4, P)       f32   rows: gamma, beta, [bq|bk|bvo], bo
    o_ref   : (1, S, D)    f32
    """
    gamma = vecs_ref[0:1, 0:D]            # (1, D)
    beta = vecs_ref[1:2, 0:D]
    b_cat = vecs_ref[2:3, :]              # (1, P)  = [bq | bk | bvo]
    bo = vecs_ref[3:4, 0:D]               # (1, D)

    def layer_norm(x):                    # (S, D); PyTorch semantics (biased var)
        mu = jnp.mean(x, axis=-1, keepdims=True)
        xc = x - mu
        var = jnp.mean(xc * xc, axis=-1, keepdims=True)
        return xc * lax.rsqrt(var + EPS) * gamma + beta

    # One fused, lane-dense projection: [LN(Q)|LN(K)|LN(V)] (S,96) @ diag(wq,wk,Wvo)
    # (96,192) -> proj = [ q | k | vo_all ] in a single MXU call (Wvo already
    # folds fc_V into out_fc per head).
    xcat = jnp.concatenate(
        [layer_norm(qkv_ref[0, 0]),
         layer_norm(qkv_ref[0, 1]),
         layer_norm(qkv_ref[0, 2])], axis=1)                        # (S, 3D)
    proj = jnp.dot(xcat, w_ref[...],
                   preferred_element_type=jnp.float32) + b_cat      # (S, P)

    # Head-merge concatenate + final out_fc matmul are fused into the head loop:
    #   out = bo + sum_h p_h @ vo_h       (vo_h = proj[:, 64+h*32 : 64+(h+1)*32])
    acc = jnp.broadcast_to(bo, (S, D))
    for h in range(H):
        qh = proj[:, h * DH:(h + 1) * DH]                           # (S, DH)
        kh = proj[:, D + h * DH:D + (h + 1) * DH]                   # (S, DH)
        # Q.K^T without materializing a transpose: contract the last dims.
        s = lax.dot_general(qh, kh, (((1,), (1,)), ((), ())),
                            preferred_element_type=jnp.float32)     # (S, S)
        s = s * SCALE + mask_ref[0, h].astype(jnp.float32)          # additive mask
        s_max = jnp.max(s, axis=-1, keepdims=True)
        e = jnp.exp(s - s_max)
        p = e * pl.reciprocal(jnp.sum(e, axis=-1, keepdims=True), approx=False)
        vo_h = proj[:, 2 * D + h * D:2 * D + (h + 1) * D]           # (S, D)
        acc = acc + jnp.dot(p, vo_h, preferred_element_type=jnp.float32)

    # dropout: eval-mode identity; residual re-reads the pre-norm Q from VMEM
    # instead of keeping it live across the unrolled head loop.
    o_ref[0] = qkv_ref[0, 0] + acc


def multihead_forward(Q, K, V, mask, params):
    """Pallas forward. mask: (b, H, S, S), nonzero == masked."""
    gamma, beta, wq, bq, wk, bk, wv, bv, wo, bo = params
    nb = Q.shape[0]

    # ---- wrapper-side operand packing (cheap XLA ops, outside the kernel) ----
    qkv = jnp.stack([Q, K, V], axis=1)                              # (nb, 3, S, D)
    mask_add = jnp.where(mask != 0, MASK_NEG, 0.0).astype(jnp.bfloat16)

    # Fold fc_V into out_fc per head (full-precision folds).
    with jax.default_matmul_precision("highest"):
        wvo = jnp.concatenate(
            [wv[:, h * DH:(h + 1) * DH] @ wo[h * DH:(h + 1) * DH, :]
             for h in range(H)], axis=1)                            # (D, H*D)
        bvo = jnp.concatenate(
            [bv[h * DH:(h + 1) * DH] @ wo[h * DH:(h + 1) * DH, :]
             for h in range(H)], axis=0)                            # (H*D,)

    # Block-diagonal fused projection weight: proj = [LN(Q)|LN(K)|LN(V)] @ w_blk.
    w_blk = jnp.zeros((3 * D, P), jnp.float32)
    w_blk = w_blk.at[0:D, 0:D].set(wq)
    w_blk = w_blk.at[D:2 * D, D:2 * D].set(wk)
    w_blk = w_blk.at[2 * D:, 2 * D:].set(wvo)

    # All vectors packed into one (4, P) slab.
    vecs = jnp.zeros((4, P), jnp.float32)
    vecs = vecs.at[0, 0:D].set(gamma)
    vecs = vecs.at[1, 0:D].set(beta)
    vecs = vecs.at[2, 0:D].set(bq)
    vecs = vecs.at[2, D:2 * D].set(bk)
    vecs = vecs.at[2, 2 * D:].set(bvo)
    vecs = vecs.at[3, 0:D].set(bo)

    return pl.pallas_call(
        _multihead_kernel,
        out_shape=jax.ShapeDtypeStruct((nb, S, D), jnp.float32),
        grid=(nb,),
        in_specs=[
            pl.BlockSpec((1, 3, S, D), lambda b: (b, 0, 0, 0)),     # per-item qkv
            pl.BlockSpec((1, H, S, S), lambda b: (b, 0, 0, 0)),     # per-item mask
            pl.BlockSpec((3 * D, P), lambda b: (0, 0)),             # weights: fetched once
            pl.BlockSpec((4, P), lambda b: (0, 0)),                 # vectors: fetched once
        ],
        out_specs=pl.BlockSpec((1, S, D), lambda b: (b, 0, 0)),
        compiler_params=pltpu.CompilerParams(
            dimension_semantics=("parallel",)),                     # 2nd TC on v7x
    )(qkv, mask_add, w_blk, vecs)


def multihead_reference(Q, K, V, mask, params):
    """Pure-JAX mirror of the PyTorch forward (eval mode), full f32 matmuls."""
    gamma, beta, wq, bq, wk, bk, wv, bv, wo, bo = params
    b = Q.shape[0]
    with jax.default_matmul_precision("highest"):
        def ln(x):
            mu = jnp.mean(x, -1, keepdims=True)
            var = jnp.mean((x - mu) ** 2, -1, keepdims=True)
            return (x - mu) / jnp.sqrt(var + EPS) * gamma + beta

        clone_Q = Q
        q = ln(Q) @ wq + bq
        k = ln(K) @ wk + bk
        v = ln(V) @ wv + bv
        q = q.reshape(b, S, H, DH).transpose(0, 2, 1, 3)
        k = k.reshape(b, S, H, DH).transpose(0, 2, 1, 3)
        v = v.reshape(b, S, H, DH).transpose(0, 2, 1, 3)
        score = jnp.einsum("bhqd,bhkd->bhqk", q, k) * SCALE
        score = jnp.where(mask != 0, float("-inf"), score)
        score = jax.nn.softmax(score, axis=-1)
        out = jnp.einsum("bhqk,bhkd->bhqd", score, v)
        out = out.transpose(0, 2, 1, 3).reshape(b, S, D)
        out = out @ wo + bo
        return clone_Q + out


def make_params(key):
    ks = jax.random.split(key, 9)
    gamma = 1.0 + 0.05 * jax.random.normal(ks[0], (D,), jnp.float32)
    beta = 0.05 * jax.random.normal(ks[1], (D,), jnp.float32)
    # Linear weights stored pre-transposed as (in, out).
    wq = 0.1 * jax.random.normal(ks[2], (D, D), jnp.float32)
    wk = 0.1 * jax.random.normal(ks[3], (D, D), jnp.float32)
    wv = 0.1 * jax.random.normal(ks[4], (D, D), jnp.float32)
    wo = 0.1 * jax.random.normal(ks[5], (D, D), jnp.float32)
    bq = 0.1 * jax.random.normal(ks[6], (D,), jnp.float32)
    bk = 0.1 * jax.random.normal(ks[7], (D,), jnp.float32)
    bv = 0.1 * jax.random.normal(ks[8], (D,), jnp.float32)
    bo = jnp.zeros((D,), jnp.float32)
    return (gamma, beta, wq, bq, wk, bk, wv, bv, wo, bo)


if __name__ == "__main__":
    key = jax.random.PRNGKey(0)
    kq, kk, kv, kp = jax.random.split(key, 4)
    Q = jax.random.normal(kq, (B, S, D), jnp.float32)
    K = jax.random.normal(kk, (B, S, D), jnp.float32)
    V = jax.random.normal(kv, (B, S, D), jnp.float32)
    # Causal mask (upper triangle masked), broadcast over batch & heads.
    causal = (jnp.arange(S)[None, :] > jnp.arange(S)[:, None]).astype(jnp.int32)
    mask = jnp.broadcast_to(causal, (B, H, S, S))
    params = make_params(kp)

    out = multihead_forward(Q, K, V, mask, params)
    out = jax.block_until_ready(out)

    ref = multihead_reference(Q, K, V, mask, params)
    assert out.shape == (B, S, D), out.shape
    # Small cushion over 1e-4 for MXU f32 multi-pass / summation-order deltas.
    assert jnp.allclose(out, ref, rtol=2e-4, atol=2e-4), (
        float(jnp.max(jnp.abs(out - ref))))
    print("KERNEL_OK")
</pallas_src>

<mosaic_0001>
module attributes {stable_mosaic.version = 11 : i64} {
  func.func @_multihead_kernel(%arg0: i32, %arg1: memref<1x3x50x32xf32, #tpu.memory_space<vmem>>, %arg2: memref<1x4x50x50xbf16, #tpu.memory_space<vmem>>, %arg3: memref<96x192xf32, #tpu.memory_space<vmem>>, %arg4: memref<4x192xf32, #tpu.memory_space<vmem>>, %arg5: memref<1x50x32xf32, #tpu.memory_space<vmem>>) attributes {dimension_semantics = [#tpu.dimension_semantics<parallel>], iteration_bounds = array<i64: 2>, scalar_prefetch = 0 : i64, scratch_operands = 0 : i64, tpu.core_type = #tpu.core_type<tc>, window_params = [{transform_indices = @transform_0, window_bounds = array<i64: 1, 3, 50, 32>}, {transform_indices = @transform_1, window_bounds = array<i64: 1, 4, 50, 50>}, {pipeline_mode = #tpu.pipeline_mode<synchronous>, transform_indices = @transform_2, window_bounds = array<i64: 96, 192>}, {pipeline_mode = #tpu.pipeline_mode<synchronous>, transform_indices = @transform_3, window_bounds = array<i64: 4, 192>}, {transform_indices = @transform_4, window_bounds = array<i64: 1, 50, 32>}]} {
    %c0 = arith.constant 0 : index
    %c0_0 = arith.constant 0 : index
    %0 = vector.load %arg4[%c0, %c0_0] : memref<4x192xf32, #tpu.memory_space<vmem>>, vector<1x32xf32>
    %c1 = arith.constant 1 : index
    %c0_1 = arith.constant 0 : index
    %1 = vector.load %arg4[%c1, %c0_1] : memref<4x192xf32, #tpu.memory_space<vmem>>, vector<1x32xf32>
    %c2 = arith.constant 2 : index
    %c0_2 = arith.constant 0 : index
    %2 = vector.load %arg4[%c2, %c0_2] : memref<4x192xf32, #tpu.memory_space<vmem>>, vector<1x192xf32>
    %c3 = arith.constant 3 : index
    %c0_3 = arith.constant 0 : index
    %3 = vector.load %arg4[%c3, %c0_3] : memref<4x192xf32, #tpu.memory_space<vmem>>, vector<1x32xf32>
    %c0_4 = arith.constant 0 : index
    %c0_5 = arith.constant 0 : index
    %c0_6 = arith.constant 0 : index
    %c0_7 = arith.constant 0 : index
    %4 = vector.load %arg1[%c0_4, %c0_5, %c0_6, %c0_7] : memref<1x3x50x32xf32, #tpu.memory_space<vmem>>, vector<1x1x50x32xf32>
    %5 = vector.shape_cast %4 : vector<1x1x50x32xf32> to vector<50x32xf32>
    %cst = arith.constant dense<0.000000e+00> : vector<50xf32>
    %6 = vector.multi_reduction <add>, %5, %cst [1] : vector<50x32xf32> to vector<50xf32>
    %7 = vector.shape_cast %6 : vector<50xf32> to vector<50x1xf32>
    %cst_8 = arith.constant 3.200000e+01 : f32
    %8 = vector.broadcast %cst_8 : f32 to vector<50x1xf32>
    %9 = arith.divf %7, %8 : vector<50x1xf32>
    %10 = vector.broadcast %9 : vector<50x1xf32> to vector<50x32xf32>
    %11 = arith.subf %5, %10 : vector<50x32xf32>
    %12 = arith.mulf %11, %11 : vector<50x32xf32>
    %cst_9 = arith.constant dense<0.000000e+00> : vector<50xf32>
    %13 = vector.multi_reduction <add>, %12, %cst_9 [1] : vector<50x32xf32> to vector<50xf32>
    %14 = vector.shape_cast %13 : vector<50xf32> to vector<50x1xf32>
    %cst_10 = arith.constant 3.200000e+01 : f32
    %15 = vector.broadcast %cst_10 : f32 to vector<50x1xf32>
    %16 = arith.divf %14, %15 : vector<50x1xf32>
    %cst_11 = arith.constant 9.99999974E-6 : f32
    %17 = vector.broadcast %cst_11 : f32 to vector<50x1xf32>
    %18 = arith.addf %16, %17 : vector<50x1xf32>
    %19 = math.rsqrt %18 : vector<50x1xf32>
    %20 = vector.broadcast %19 : vector<50x1xf32> to vector<50x32xf32>
    %21 = arith.mulf %11, %20 : vector<50x32xf32>
    %22 = vector.broadcast %0 : vector<1x32xf32> to vector<50x32xf32>
    %23 = arith.mulf %21, %22 : vector<50x32xf32>
    %24 = vector.broadcast %1 : vector<1x32xf32> to vector<50x32xf32>
    %25 = arith.addf %23, %24 : vector<50x32xf32>
    %c0_12 = arith.constant 0 : index
    %c1_13 = arith.constant 1 : index
    %c0_14 = arith.constant 0 : index
    %c0_15 = arith.constant 0 : index
    %26 = vector.load %arg1[%c0_12, %c1_13, %c0_14, %c0_15] : memref<1x3x50x32xf32, #tpu.memory_space<vmem>>, vector<1x1x50x32xf32>
    %27 = vector.shape_cast %26 : vector<1x1x50x32xf32> to vector<50x32xf32>
    %cst_16 = arith.constant dense<0.000000e+00> : vector<50xf32>
    %28 = vector.multi_reduction <add>, %27, %cst_16 [1] : vector<50x32xf32> to vector<50xf32>
    %29 = vector.shape_cast %28 : vector<50xf32> to vector<50x1xf32>
    %cst_17 = arith.constant 3.200000e+01 : f32
    %30 = vector.broadcast %cst_17 : f32 to vector<50x1xf32>
    %31 = arith.divf %29, %30 : vector<50x1xf32>
    %32 = vector.broadcast %31 : vector<50x1xf32> to vector<50x32xf32>
    %33 = arith.subf %27, %32 : vector<50x32xf32>
    %34 = arith.mulf %33, %33 : vector<50x32xf32>
    %cst_18 = arith.constant dense<0.000000e+00> : vector<50xf32>
    %35 = vector.multi_reduction <add>, %34, %cst_18 [1] : vector<50x32xf32> to vector<50xf32>
    %36 = vector.shape_cast %35 : vector<50xf32> to vector<50x1xf32>
    %cst_19 = arith.constant 3.200000e+01 : f32
    %37 = vector.broadcast %cst_19 : f32 to vector<50x1xf32>
    %38 = arith.divf %36, %37 : vector<50x1xf32>
    %cst_20 = arith.constant 9.99999974E-6 : f32
    %39 = vector.broadcast %cst_20 : f32 to vector<50x1xf32>
    %40 = arith.addf %38, %39 : vector<50x1xf32>
    %41 = math.rsqrt %40 : vector<50x1xf32>
    %42 = vector.broadcast %41 : vector<50x1xf32> to vector<50x32xf32>
    %43 = arith.mulf %33, %42 : vector<50x32xf32>
    %44 = vector.broadcast %0 : vector<1x32xf32> to vector<50x32xf32>
    %45 = arith.mulf %43, %44 : vector<50x32xf32>
    %46 = vector.broadcast %1 : vector<1x32xf32> to vector<50x32xf32>
    %47 = arith.addf %45, %46 : vector<50x32xf32>
    %c0_21 = arith.constant 0 : index
    %c2_22 = arith.constant 2 : index
    %c0_23 = arith.constant 0 : index
    %c0_24 = arith.constant 0 : index
    %48 = vector.load %arg1[%c0_21, %c2_22, %c0_23, %c0_24] : memref<1x3x50x32xf32, #tpu.memory_space<vmem>>, vector<1x1x50x32xf32>
    %49 = vector.shape_cast %48 : vector<1x1x50x32xf32> to vector<50x32xf32>
    %cst_25 = arith.constant dense<0.000000e+00> : vector<50xf32>
    %50 = vector.multi_reduction <add>, %49, %cst_25 [1] : vector<50x32xf32> to vector<50xf32>
    %51 = vector.shape_cast %50 : vector<50xf32> to vector<50x1xf32>
    %cst_26 = arith.constant 3.200000e+01 : f32
    %52 = vector.broadcast %cst_26 : f32 to vector<50x1xf32>
    %53 = arith.divf %51, %52 : vector<50x1xf32>
    %54 = vector.broadcast %53 : vector<50x1xf32> to vector<50x32xf32>
    %55 = arith.subf %49, %54 : vector<50x32xf32>
    %56 = arith.mulf %55, %55 : vector<50x32xf32>
    %cst_27 = arith.constant dense<0.000000e+00> : vector<50xf32>
    %57 = vector.multi_reduction <add>, %56, %cst_27 [1] : vector<50x32xf32> to vector<50xf32>
    %58 = vector.shape_cast %57 : vector<50xf32> to vector<50x1xf32>
    %cst_28 = arith.constant 3.200000e+01 : f32
    %59 = vector.broadcast %cst_28 : f32 to vector<50x1xf32>
    %60 = arith.divf %58, %59 : vector<50x1xf32>
    %cst_29 = arith.constant 9.99999974E-6 : f32
    %61 = vector.broadcast %cst_29 : f32 to vector<50x1xf32>
    %62 = arith.addf %60, %61 : vector<50x1xf32>
    %63 = math.rsqrt %62 : vector<50x1xf32>
    %64 = vector.broadcast %63 : vector<50x1xf32> to vector<50x32xf32>
    %65 = arith.mulf %55, %64 : vector<50x32xf32>
    %66 = vector.broadcast %0 : vector<1x32xf32> to vector<50x32xf32>
    %67 = arith.mulf %65, %66 : vector<50x32xf32>
    %68 = vector.broadcast %1 : vector<1x32xf32> to vector<50x32xf32>
    %69 = arith.addf %67, %68 : vector<50x32xf32>
    %70 = tpu.concatenate %25, %47, %69 in 1 : vector<50x32xf32>, vector<50x32xf32>, vector<50x32xf32> -> vector<50x96xf32>
    %c0_30 = arith.constant 0 : index
    %c0_31 = arith.constant 0 : index
    %71 = vector.load %arg3[%c0_30, %c0_31] : memref<96x192xf32, #tpu.memory_space<vmem>>, vector<96x192xf32>
    %cst_32 = arith.constant dense<0.000000e+00> : vector<50x192xf32>
    %72 = tpu.matmul %70, %71, %cst_32 {dimension_numbers = #tpu.dot_dimension_numbers<[1], [0], [0], [1], [0, 0, 1, 1], [], []>} : vector<50x96xf32>, vector<96x192xf32>, vector<50x192xf32> -> vector<50x192xf32>
    %73 = vector.broadcast %2 : vector<1x192xf32> to vector<50x192xf32>
    %74 = arith.addf %72, %73 : vector<50x192xf32>
    %75 = vector.shape_cast %3 : vector<1x32xf32> to vector<1x32xf32>
    %76 = vector.broadcast %75 : vector<1x32xf32> to vector<50x32xf32>
    %77 = vector.extract_strided_slice %74 {offsets = [0, 0], sizes = [50, 8], strides = [1, 1]} : vector<50x192xf32> to vector<50x8xf32>
    %78 = vector.extract_strided_slice %74 {offsets = [0, 32], sizes = [50, 8], strides = [1, 1]} : vector<50x192xf32> to vector<50x8xf32>
    %cst_33 = arith.constant dense<0.000000e+00> : vector<50x50xf32>
    %79 = tpu.matmul %77, %78, %cst_33 {dimension_numbers = #tpu.dot_dimension_numbers<[1], [1], [0], [0], [0, 0, 1, 0], [], []>} : vector<50x8xf32>, vector<50x8xf32>, vector<50x50xf32> -> vector<50x50xf32>
    %cst_34 = arith.constant 0.353553385 : f32
    %80 = vector.broadcast %cst_34 : f32 to vector<50x50xf32>
    %81 = arith.mulf %79, %80 : vector<50x50xf32>
    %c0_35 = arith.constant 0 : index
    %c0_36 = arith.constant 0 : index
    %c0_37 = arith.constant 0 : index
    %c0_38 = arith.constant 0 : index
    %82 = vector.load %arg2[%c0_35, %c0_36, %c0_37, %c0_38] : memref<1x4x50x50xbf16, #tpu.memory_space<vmem>>, vector<1x1x50x50xbf16>
    %83 = vector.shape_cast %82 : vector<1x1x50x50xbf16> to vector<50x50xbf16>
    %84 = arith.extf %83 : vector<50x50xbf16> to vector<50x50xf32>
    %85 = arith.addf %81, %84 : vector<50x50xf32>
    %cst_39 = arith.constant dense<0xFF800000> : vector<50xf32>
    %86 = vector.multi_reduction <maximumf>, %85, %cst_39 [1] : vector<50x50xf32> to vector<50xf32>
    %87 = vector.shape_cast %86 : vector<50xf32> to vector<50x1xf32>
    %88 = vector.broadcast %87 : vector<50x1xf32> to vector<50x50xf32>
    %89 = arith.subf %85, %88 : vector<50x50xf32>
    %90 = math.exp %89 : vector<50x50xf32>
    %cst_40 = arith.constant dense<0.000000e+00> : vector<50xf32>
    %91 = vector.multi_reduction <add>, %90, %cst_40 [1] : vector<50x50xf32> to vector<50xf32>
    %92 = vector.shape_cast %91 : vector<50xf32> to vector<50x1xf32>
    %93 = tpu.reciprocal %92 : vector<50x1xf32> -> vector<50x1xf32>
    %94 = vector.broadcast %93 : vector<50x1xf32> to vector<50x50xf32>
    %95 = arith.mulf %90, %94 : vector<50x50xf32>
    %96 = vector.extract_strided_slice %74 {offsets = [0, 64], sizes = [50, 32], strides = [1, 1]} : vector<50x192xf32> to vector<50x32xf32>
    %cst_41 = arith.constant dense<0.000000e+00> : vector<50x32xf32>
    %97 = tpu.matmul %95, %96, %cst_41 {dimension_numbers = #tpu.dot_dimension_numbers<[1], [0], [0], [1], [0, 0, 1, 1], [], []>} : vector<50x50xf32>, vector<50x32xf32>, vector<50x32xf32> -> vector<50x32xf32>
    %98 = arith.addf %76, %97 : vector<50x32xf32>
    %99 = vector.extract_strided_slice %74 {offsets = [0, 8], sizes = [50, 8], strides = [1, 1]} : vector<50x192xf32> to vector<50x8xf32>
    %100 = vector.extract_strided_slice %74 {offsets = [0, 40], sizes = [50, 8], strides = [1, 1]} : vector<50x192xf32> to vector<50x8xf32>
    %cst_42 = arith.constant dense<0.000000e+00> : vector<50x50xf32>
    %101 = tpu.matmul %99, %100, %cst_42 {dimension_numbers = #tpu.dot_dimension_numbers<[1], [1], [0], [0], [0, 0, 1, 0], [], []>} : vector<50x8xf32>, vector<50x8xf32>, vector<50x50xf32> -> vector<50x50xf32>
    %cst_43 = arith.constant 0.353553385 : f32
    %102 = vector.broadcast %cst_43 : f32 to vector<50x50xf32>
    %103 = arith.mulf %101, %102 : vector<50x50xf32>
    %c0_44 = arith.constant 0 : index
    %c1_45 = arith.constant 1 : index
    %c0_46 = arith.constant 0 : index
    %c0_47 = arith.constant 0 : index
    %104 = vector.load %arg2[%c0_44, %c1_45, %c0_46, %c0_47] : memref<1x4x50x50xbf16, #tpu.memory_space<vmem>>, vector<1x1x50x50xbf16>
    %105 = vector.shape_cast %104 : vector<1x1x50x50xbf16> to vector<50x50xbf16>
    %106 = arith.extf %105 : vector<50x50xbf16> to vector<50x50xf32>
    %107 = arith.addf %103, %106 : vector<50x50xf32>
    %cst_48 = arith.constant dense<0xFF800000> : vector<50xf32>
    %108 = vector.multi_reduction <maximumf>, %107, %cst_48 [1] : vector<50x50xf32> to vector<50xf32>
    %109 = vector.shape_cast %108 : vector<50xf32> to vector<50x1xf32>
    %110 = vector.broadcast %109 : vector<50x1xf32> to vector<50x50xf32>
    %111 = arith.subf %107, %110 : vector<50x50xf32>
    %112 = math.exp %111 : vector<50x50xf32>
    %cst_49 = arith.constant dense<0.000000e+00> : vector<50xf32>
    %113 = vector.multi_reduction <add>, %112, %cst_49 [1] : vector<50x50xf32> to vector<50xf32>
    %114 = vector.shape_cast %113 : vector<50xf32> to vector<50x1xf32>
    %115 = tpu.reciprocal %114 : vector<50x1xf32> -> vector<50x1xf32>
    %116 = vector.broadcast %115 : vector<50x1xf32> to vector<50x50xf32>
    %117 = arith.mulf %112, %116 : vector<50x50xf32>
    %118 = vector.extract_strided_slice %74 {offsets = [0, 96], sizes = [50, 32], strides = [1, 1]} : vector<50x192xf32> to vector<50x32xf32>
    %cst_50 = arith.constant dense<0.000000e+00> : vector<50x32xf32>
    %119 = tpu.matmul %117, %118, %cst_50 {dimension_numbers = #tpu.dot_dimension_numbers<[1], [0], [0], [1], [0, 0, 1, 1], [], []>} : vector<50x50xf32>, vector<50x32xf32>, vector<50x32xf32> -> vector<50x32xf32>
    %120 = arith.addf %98, %119 : vector<50x32xf32>
    %121 = vector.extract_strided_slice %74 {offsets = [0, 16], sizes = [50, 8], strides = [1, 1]} : vector<50x192xf32> to vector<50x8xf32>
    %122 = vector.extract_strided_slice %74 {offsets = [0, 48], sizes = [50, 8], strides = [1, 1]} : vector<50x192xf32> to vector<50x8xf32>
    %cst_51 = arith.constant dense<0.000000e+00> : vector<50x50xf32>
    %123 = tpu.matmul %121, %122, %cst_51 {dimension_numbers = #tpu.dot_dimension_numbers<[1], [1], [0], [0], [0, 0, 1, 0], [], []>} : vector<50x8xf32>, vector<50x8xf32>, vector<50x50xf32> -> vector<50x50xf32>
    %cst_52 = arith.constant 0.353553385 : f32
    %124 = vector.broadcast %cst_52 : f32 to vector<50x50xf32>
    %125 = arith.mulf %123, %124 : vector<50x50xf32>
    %c0_53 = arith.constant 0 : index
    %c2_54 = arith.constant 2 : index
    %c0_55 = arith.constant 0 : index
    %c0_56 = arith.constant 0 : index
    %126 = vector.load %arg2[%c0_53, %c2_54, %c0_55, %c0_56] : memref<1x4x50x50xbf16, #tpu.memory_space<vmem>>, vector<1x1x50x50xbf16>
    %127 = vector.shape_cast %126 : vector<1x1x50x50xbf16> to vector<50x50xbf16>
    %128 = arith.extf %127 : vector<50x50xbf16> to vector<50x50xf32>
    %129 = arith.addf %125, %128 : vector<50x50xf32>
    %cst_57 = arith.constant dense<0xFF800000> : vector<50xf32>
    %130 = vector.multi_reduction <maximumf>, %129, %cst_57 [1] : vector<50x50xf32> to vector<50xf32>
    %131 = vector.shape_cast %130 : vector<50xf32> to vector<50x1xf32>
    %132 = vector.broadcast %131 : vector<50x1xf32> to vector<50x50xf32>
    %133 = arith.subf %129, %132 : vector<50x50xf32>
    %134 = math.exp %133 : vector<50x50xf32>
    %cst_58 = arith.constant dense<0.000000e+00> : vector<50xf32>
    %135 = vector.multi_reduction <add>, %134, %cst_58 [1] : vector<50x50xf32> to vector<50xf32>
    %136 = vector.shape_cast %135 : vector<50xf32> to vector<50x1xf32>
    %137 = tpu.reciprocal %136 : vector<50x1xf32> -> vector<50x1xf32>
    %138 = vector.broadcast %137 : vector<50x1xf32> to vector<50x50xf32>
    %139 = arith.mulf %134, %138 : vector<50x50xf32>
    %140 = vector.extract_strided_slice %74 {offsets = [0, 128], sizes = [50, 32], strides = [1, 1]} : vector<50x192xf32> to vector<50x32xf32>
    %cst_59 = arith.constant dense<0.000000e+00> : vector<50x32xf32>
    %141 = tpu.matmul %139, %140, %cst_59 {dimension_numbers = #tpu.dot_dimension_numbers<[1], [0], [0], [1], [0, 0, 1, 1], [], []>} : vector<50x50xf32>, vector<50x32xf32>, vector<50x32xf32> -> vector<50x32xf32>
    %142 = arith.addf %120, %141 : vector<50x32xf32>
    %143 = vector.extract_strided_slice %74 {offsets = [0, 24], sizes = [50, 8], strides = [1, 1]} : vector<50x192xf32> to vector<50x8xf32>
    %144 = vector.extract_strided_slice %74 {offsets = [0, 56], sizes = [50, 8], strides = [1, 1]} : vector<50x192xf32> to vector<50x8xf32>
    %cst_60 = arith.constant dense<0.000000e+00> : vector<50x50xf32>
    %145 = tpu.matmul %143, %144, %cst_60 {dimension_numbers = #tpu.dot_dimension_numbers<[1], [1], [0], [0], [0, 0, 1, 0], [], []>} : vector<50x8xf32>, vector<50x8xf32>, vector<50x50xf32> -> vector<50x50xf32>
    %cst_61 = arith.constant 0.353553385 : f32
    %146 = vector.broadcast %cst_61 : f32 to vector<50x50xf32>
    %147 = arith.mulf %145, %146 : vector<50x50xf32>
    %c0_62 = arith.constant 0 : index
    %c3_63 = arith.constant 3 : index
    %c0_64 = arith.constant 0 : index
    %c0_65 = arith.constant 0 : index
    %148 = vector.load %arg2[%c0_62, %c3_63, %c0_64, %c0_65] : memref<1x4x50x50xbf16, #tpu.memory_space<vmem>>, vector<1x1x50x50xbf16>
    %149 = vector.shape_cast %148 : vector<1x1x50x50xbf16> to vector<50x50xbf16>
    %150 = arith.extf %149 : vector<50x50xbf16> to vector<50x50xf32>
    %151 = arith.addf %147, %150 : vector<50x50xf32>
    %cst_66 = arith.constant dense<0xFF800000> : vector<50xf32>
    %152 = vector.multi_reduction <maximumf>, %151, %cst_66 [1] : vector<50x50xf32> to vector<50xf32>
    %153 = vector.shape_cast %152 : vector<50xf32> to vector<50x1xf32>
    %154 = vector.broadcast %153 : vector<50x1xf32> to vector<50x50xf32>
    %155 = arith.subf %151, %154 : vector<50x50xf32>
    %156 = math.exp %155 : vector<50x50xf32>
    %cst_67 = arith.constant dense<0.000000e+00> : vector<50xf32>
    %157 = vector.multi_reduction <add>, %156, %cst_67 [1] : vector<50x50xf32> to vector<50xf32>
    %158 = vector.shape_cast %157 : vector<50xf32> to vector<50x1xf32>
    %159 = tpu.reciprocal %158 : vector<50x1xf32> -> vector<50x1xf32>
    %160 = vector.broadcast %159 : vector<50x1xf32> to vector<50x50xf32>
    %161 = arith.mulf %156, %160 : vector<50x50xf32>
    %162 = vector.extract_strided_slice %74 {offsets = [0, 160], sizes = [50, 32], strides = [1, 1]} : vector<50x192xf32> to vector<50x32xf32>
    %cst_68 = arith.constant dense<0.000000e+00> : vector<50x32xf32>
    %163 = tpu.matmul %161, %162, %cst_68 {dimension_numbers = #tpu.dot_dimension_numbers<[1], [0], [0], [1], [0, 0, 1, 1], [], []>} : vector<50x50xf32>, vector<50x32xf32>, vector<50x32xf32> -> vector<50x32xf32>
    %164 = arith.addf %142, %163 : vector<50x32xf32>
    %c0_69 = arith.constant 0 : index
    %c0_70 = arith.constant 0 : index
    %c0_71 = arith.constant 0 : index
    %c0_72 = arith.constant 0 : index
    %165 = vector.load %arg1[%c0_69, %c0_70, %c0_71, %c0_72] : memref<1x3x50x32xf32, #tpu.memory_space<vmem>>, vector<1x1x50x32xf32>
    %166 = vector.shape_cast %165 : vector<1x1x50x32xf32> to vector<50x32xf32>
    %167 = arith.addf %166, %164 : vector<50x32xf32>
    %c0_73 = arith.constant 0 : index
    %c0_74 = arith.constant 0 : index
    %c0_75 = arith.constant 0 : index
    %168 = vector.load %arg5[%c0_73, %c0_74, %c0_75] : memref<1x50x32xf32, #tpu.memory_space<vmem>>, vector<1x50x32xf32>
    %169 = vector.shape_cast %168 : vector<1x50x32xf32> to vector<50x32xf32>
    %170 = vector.shape_cast %167 : vector<50x32xf32> to vector<1x50x32xf32>
    tpu.vector_store %arg5[%c0_73, %c0_74, %c0_75], %170 {strides = array<i32>} : memref<1x50x32xf32, #tpu.memory_space<vmem>>, vector<1x50x32xf32>,
    return
  }
  func.func @transform_0(%arg0: i32) -> (i32, i32, i32, i32) {
    %c0_i32 = arith.constant 0 : i32
    %c0_i32_0 = arith.constant 0 : i32
    %c0_i32_1 = arith.constant 0 : i32
    %c0_i32_2 = arith.constant 0 : i32
    return %arg0, %c0_i32, %c0_i32_0, %c0_i32_1 : i32, i32, i32, i32
  }
  func.func @transform_1(%arg0: i32) -> (i32, i32, i32, i32) {
    %c0_i32 = arith.constant 0 : i32
    %c0_i32_0 = arith.constant 0 : i32
    %c0_i32_1 = arith.constant 0 : i32
    %c0_i32_2 = arith.constant 0 : i32
    return %arg0, %c0_i32, %c0_i32_0, %c0_i32_1 : i32, i32, i32, i32
  }
  func.func @transform_2(%arg0: i32) -> (i32, i32) {
    %c0_i32 = arith.constant 0 : i32
    %c0_i32_0 = arith.constant 0 : i32
    %c0_i32_1 = arith.constant 0 : i32
    return %c0_i32, %c0_i32_0 : i32, i32
  }
  func.func @transform_3(%arg0: i32) -> (i32, i32) {
    %c0_i32 = arith.constant 0 : i32
    %c0_i32_0 = arith.constant 0 : i32
    %c0_i32_1 = arith.constant 0 : i32
    return %c0_i32, %c0_i32_0 : i32, i32
  }
  func.func @transform_4(%arg0: i32) -> (i32, i32, i32) {
    %c0_i32 = arith.constant 0 : i32
    %c0_i32_0 = arith.constant 0 : i32
    %c0_i32_1 = arith.constant 0 : i32
    return %arg0, %c0_i32, %c0_i32_0 : i32, i32, i32
  }
}

</mosaic_0001>

<bundles_post_ra>
// kernel: tpu_custom_call.1
= control target key start
LH: loop header
LB: loop body
LE: loop exit
PB: predicated region body
PF: predicated region fallthrough
CT: control target
= control target key end

     0   :  { %s3349_s15 = smov 0   ;;  %s4587_s0 = inlined_call_operand.vmem [shape: f32[2,3,50,32], index: 0, kind: input, shape index: {}]   ;;  %s4588_s1 = inlined_call_operand.vmem [shape: bf16[2,4,50,50], index: 1, kind: input, shape index: {}]   ;;  %s4589_s2 = inlined_call_operand.vmem [shape: f32[96,192], index: 2, kind: input, shape index: {}]   ;;  %s4590_s3 = inlined_call_operand.vmem [shape: f32[4,192], index: 3, kind: input, shape index: {}]   ;;  %s4591_s4 = inlined_call_operand.vmem [shape: f32[2,50,32], index: 4, kind: output, shape index: {}]  }
   0x1 LB: > { %s2523_s16 = sadd.s32 4294967295, %s3311_s15   ;;  %p2527_p0 = scmp.ge.s32.totalorder %s3311_s15, 1  ;;  %s3311_s15 = sphi %s3349_s15, %s14_s15  }
   0x2   : > { %p172_p1 = scmp.lt.s32.totalorder %s3311_s15, 3 }
   0x4   : > { %p173_p2 = pnand %p2527_p0, %p172_p1 }
   0x5   : > { %p203_p3 = scmp.lt.s32.totalorder (!%p173_p2), %s2523_s16, 1  ;;  %s3313_s14 = smov (!%p173_p2), 32  }
   0x6   : > { %176 = sbr.rel (%p173_p2) target bundleno = 1717 (0x6b5), region = 36  ;;  %s3315_s28 = smov (!%p173_p2), 64  }
   0x7   : > { %s3316_s5 = smov (!%p173_p2), 96   ;;  %s3317_s6 = smov (!%p173_p2), 88  }
   0x8   : > { %s3319_s7 = smov (!%p173_p2), 80   ;;  %s3320_s8 = smov (!%p173_p2), 120  }
   0x9   : > { %s3321_s9 = smov (!%p173_p2), 72   ;;  %s3322_s10 = smov (!%p173_p2), 112  }
   0xa   : > { %s3323_s11 = smov (!%p173_p2), 104  }
   0xb   : > { %s4596_s16 = smov (!%p203_p3, %s2523_s16), 1  ;;  %vm230_vm0 = vcmask 261120   ;;  %vm249_vm1 = vcmask 254976   ;;  %vm635_vm2 = vcmask 523264   ;;  %vm678_vm3 = vcmask 785408  }
   0xc   : > { %s3122_s17 = smul.u32 168, %s4596_s16  ;;  %vm3318_vm4 = vmmov 0   ;;  %vm832_vm5 = vcmask 64512   ;;  %vm1109_vm6 = vcmask 1041408   ;;  %vm989_vm7 = vcmask 408576  }
   0xd   : > { %s3123_s12 = smul.u32 112, %s4596_s16  ;;  %vm1008_vm8 = vcmask 402432  }
   0xe   : > { %s3363_s20 = scalar_lea.vmem %s4587_s0, %s3122_s17  ;;  %s3124_s21 = smul.u32 56, %s4596_s16 }
   0xf   : > { %v3366_v0 = vld [vmem:[%s3363_s20 + $0x40] sm:$0xff]  ;;  %v3369_v1 = vld [vmem:[%s3363_s20 + $0x38] sm:$0xff]  ;;  %v3379_v5 = vld [vmem:[%s3363_s20 + $0x70] sm:$0xff]  ;;  %s4074_s18 = scalar_lea.vmem %s4588_s1, %s3123_s12 }
  0x10   : > { %v3372_v2 = vld [vmem:[%s3363_s20 + $0x78] sm:$0xff]  ;;  %v357_v3 = vsel %vm230_vm0, %v3366_v0, 0.0  ;;  %v354_v4 = vsel %vm230_vm0, %v3369_v1, 0.0  ;;  %v467_v7 = vsel %vm230_vm0, %v3379_v5, 0.0  ;;  %v3386_v8 = vld [vmem:[%s3363_s20 + $0x80] sm:$0xff]  ;;  %v3389_v9 = vld [vmem:[%s3363_s20 + $0x48] sm:$0xff]  ;;  %s4559_s24 = scalar_lea.vmem %s4591_s4, %s3124_s21 }
  0x11   : > { %358 = vadd.xlane.f32.xlu1 %v357_v3  ;;  %355 = vadd.xlane.f32.xlu0 %v354_v4  ;;  %v470_v6 = vsel %vm230_vm0, %v3372_v2, 0.0  ;;  %v473_v10 = vsel %vm230_vm0, %v3386_v8, 0.0  ;;  %v360_v11 = vsel %vm230_vm0, %v3389_v9, 0.0  ;;  %v3396_v12 = vld [vmem:[%s3363_s20 + $0x88] sm:$0xff]  ;;  %v3399_v13 = vld [vmem:[%s3363_s20 + $0x50] sm:$0xff]  ;;  %v3409_v17 = vld [vmem:[%s3363_s20 + $0x58] sm:$0xff] }
  0x12   : > { %v476_v14 = vsel %vm230_vm0, %v3396_v12, 0.0  ;;  %v363_v15 = vsel %vm230_vm0, %v3399_v13, 0.0  ;;  %v3406_v16 = vld [vmem:[%s3363_s20 + $0x90] sm:$0xff]  ;;  %v366_v19 = vsel %vm230_vm0, %v3409_v17, 0.0  ;;  %v3416_v20 = vld [vmem:[%s3363_s20 + $0x98] sm:$0xff]  ;;  %v3419_v21 = vld [vmem:[%s3363_s20 + $0x60] sm:$0xff] }
  0x13   : > { %v479_v18 = vsel %vm230_vm0, %v3406_v16, 0.0  ;;  %v482_v22 = vsel %vm230_vm0, %v3416_v20, 0.0  ;;  %v369_v23 = vsel %vm230_vm0, %v3419_v21, 0.0  ;;  %v3426_v24 = vld [vmem:[%s3363_s20 + $0xa0] sm:$0x3]  ;;  %v3436_v28 = vld [vmem:[%s3363_s20 + $0x8] sm:$0xff] }
  0x14   : > { %v3429_v25 = vld [vmem:[%s3363_s20 + $0x68] sm:$0x3]  ;;  %v485_v26 = vsel %vm249_vm1, %v3426_v24, 0.0  ;;  %v3439_v29 = vld [vmem:[%s3363_s20] sm:$0xff]  ;;  %v234_v30 = vsel %vm230_vm0, %v3436_v28, 0.0  ;;  %v3446_v32 = vld [vmem:[%s3363_s20 + $0x18] sm:$0xff] }
  0x15   : > { %471 = vadd.xlane.f32.xlu1 %v470_v6  ;;  %468 = vadd.xlane.f32.xlu0 %v467_v7  ;;  %v372_v27 = vsel %vm249_vm1, %v3429_v25, 0.0  ;;  %v231_v31 = vsel %vm230_vm0, %v3439_v29, 0.0  ;;  %v3449_v33 = vld [vmem:[%s3363_s20 + $0x10] sm:$0xff]  ;;  %v240_v34 = vsel %vm230_vm0, %v3446_v32, 0.0  ;;  %v3456_v36 = vld [vmem:[%s3363_s20 + $0x20] sm:$0xff]  ;;  %v3461_v38 = vld [vmem:[%s3363_s20 + $0x28] sm:$0xff] }
  0x16   : > { %v237_v35 = vsel %vm230_vm0, %v3449_v33, 0.0  ;;  %v243_v37 = vsel %vm230_vm0, %v3456_v36, 0.0  ;;  %v246_v39 = vsel %vm230_vm0, %v3461_v38, 0.0  ;;  %v3488_v62 = vld [vmem:[%s3363_s20 + $0x30] sm:$0x3] }
  0x19   : > { %474 = vadd.xlane.f32.xlu1 %v473_v10  ;;  %361 = vadd.xlane.f32.xlu0 %v360_v11 }
  0x1d   : > { %477 = vadd.xlane.f32.xlu1 %v476_v14  ;;  %364 = vadd.xlane.f32.xlu0 %v363_v15 }
  0x21   : > { %480 = vadd.xlane.f32.xlu1 %v479_v18  ;;  %367 = vadd.xlane.f32.xlu0 %v366_v19 }
  0x25   : > { %483 = vadd.xlane.f32.xlu1 %v482_v22  ;;  %370 = vadd.xlane.f32.xlu0 %v369_v23 }
  0x29   : > { %486 = vadd.xlane.f32.xlu1 %v485_v26  ;;  %373 = vadd.xlane.f32.xlu0 %v372_v27 }
  0x2d   : > { %235 = vadd.xlane.f32.xlu1 %v234_v30  ;;  %232 = vadd.xlane.f32.xlu0 %v231_v31 }
  0x31   : > { %241 = vadd.xlane.f32.xlu1 %v240_v34  ;;  %238 = vadd.xlane.f32.xlu0 %v237_v35 }
  0x35   : > { %244 = vadd.xlane.f32.xlu0 %v243_v37 }
  0x39   : > { %247 = vadd.xlane.f32.xlu0 %v246_v39 }
  0x9a   : > { %v359_v40 = vpop.xlane.xlu1 %358  ;;  %v356_v41 = vpop.xlane.xlu0 %355 }
  0x9b   : > { %v376_v42 = vmul.f32 0.03125, %v359_v40  ;;  %v375_v43 = vmul.f32 0.03125, %v356_v41 }
  0x9d   : > { %v3466_v44 = vsub.f32 %v3366_v0, %v376_v42  ;;  %v3469_v45 = vsub.f32 %v3369_v1, %v375_v43 }
  0x9e   : > { %v472_v46 = vpop.xlane.xlu1 %471  ;;  %v469_v47 = vpop.xlane.xlu0 %468 }
  0x9f   : > { %v489_v48 = vmul.f32 0.03125, %v472_v46  ;;  %v488_v49 = vmul.f32 0.03125, %v469_v47  ;;  %v389_v50 = vmul.f32 %v3469_v45, %v3469_v45  ;;  %v390_v51 = vmul.f32 %v3466_v44, %v3466_v44 }
  0xa1   : > { %v3476_v52 = vsub.f32 %v3372_v2, %v489_v48  ;;  %v3479_v53 = vsub.f32 %v3379_v5, %v488_v49  ;;  %v396_v54 = vsel %vm230_vm0, %v389_v50, 0.0  ;;  %v399_v55 = vsel %vm230_vm0, %v390_v51, 0.0 }
  0xa2   : > { %v475_v56 = vpop.xlane.xlu1 %474  ;;  %v362_v57 = vpop.xlane.xlu0 %361  ;;  %397 = vadd.xlane.f32.xlu1 %v396_v54  ;;  %400 = vadd.xlane.f32.xlu0 %v399_v55  ;;  %v250_v5 = vsel %vm249_vm1, %v3488_v62, 0.0 }
  0xa3   : > { %v490_v58 = vmul.f32 0.03125, %v475_v56  ;;  %v377_v59 = vmul.f32 0.03125, %v362_v57  ;;  %v502_v60 = vmul.f32 %v3479_v53, %v3479_v53  ;;  %v503_v61 = vmul.f32 %v3476_v52, %v3476_v52 }
  0xa5   : > { %v3491_v63 = vsub.f32 %v3386_v8, %v490_v58  ;;  %v3494_v0 = vsub.f32 %v3389_v9, %v377_v59  ;;  %v509_v1 = vsel %vm230_vm0, %v502_v60, 0.0  ;;  %v512_v2 = vsel %vm230_vm0, %v503_v61, 0.0 }
  0xa6   : > { %v478_v3 = vpop.xlane.xlu1 %477  ;;  %v365_v4 = vpop.xlane.xlu0 %364  ;;  %510 = vadd.xlane.f32.xlu1 %v509_v1  ;;  %513 = vadd.xlane.f32.xlu0 %v512_v2 }
  0xa7   : > { %v491_v6 = vmul.f32 0.03125, %v478_v3  ;;  %v378_v7 = vmul.f32 0.03125, %v365_v4  ;;  %v504_v8 = vmul.f32 %v3491_v63, %v3491_v63  ;;  %v391_v9 = vmul.f32 %v3494_v0, %v3494_v0 }
  0xa9   : > { %v3505_v10 = vsub.f32 %v3396_v12, %v491_v6  ;;  %v3508_v11 = vsub.f32 %v3399_v13, %v378_v7  ;;  %v515_v14 = vsel %vm230_vm0, %v504_v8, 0.0  ;;  %v402_v19 = vsel %vm230_vm0, %v391_v9, 0.0 }
  0xaa   : > { %v481_v15 = vpop.xlane.xlu1 %480  ;;  %v368_v18 = vpop.xlane.xlu0 %367  ;;  %251 = vadd.xlane.f32.xlu1 %v250_v5  ;;  %516 = vadd.xlane.f32.xlu0 %v515_v14 }
  0xab   : > { %v492_v22 = vmul.f32 0.03125, %v481_v15  ;;  %v379_v23 = vmul.f32 0.03125, %v368_v18  ;;  %v505_v26 = vmul.f32 %v3505_v10, %v3505_v10  ;;  %v392_v12 = vmul.f32 %v3508_v11, %v3508_v11 }
  0xad   : > { %v3517_v27 = vsub.f32 %v3406_v16, %v492_v22  ;;  %v3520_v13 = vsub.f32 %v3409_v17, %v379_v23  ;;  %v518_v30 = vsel %vm230_vm0, %v505_v26, 0.0  ;;  %v405_v35 = vsel %vm230_vm0, %v392_v12, 0.0 }
  0xae   : > { %v484_v31 = vpop.xlane.xlu1 %483  ;;  %v371_v34 = vpop.xlane.xlu0 %370  ;;  %403 = vadd.xlane.f32.xlu1 %v402_v19  ;;  %519 = vadd.xlane.f32.xlu0 %v518_v30 }
  0xaf   : > { %v493_v37 = vmul.f32 0.03125, %v484_v31  ;;  %v380_v39 = vmul.f32 0.03125, %v371_v34  ;;  %v506_v40 = vmul.f32 %v3517_v27, %v3517_v27  ;;  %v393_v16 = vmul.f32 %v3520_v13, %v3520_v13 }
  0xb1   : > { %v3529_v41 = vsub.f32 %v3416_v20, %v493_v37  ;;  %v3532_v17 = vsub.f32 %v3419_v21, %v380_v39  ;;  %v521_v42 = vsel %vm230_vm0, %v506_v40, 0.0  ;;  %v408_v47 = vsel %vm230_vm0, %v393_v16, 0.0  ;;  %v666_v37 = vld [vmem:[%s4589_s2 + $0xb8] sm:$0xff]  ;;  %v665_v39 = vld [vmem:[%s4589_s2 + $0xb0] sm:$0xff]  ;;  %v663_v40 = vld [vmem:[%s4589_s2 + $0xa0] sm:$0xff] }
  0xb2   : > { %v487_v43 = vpop.xlane.xlu1 %486  ;;  %v374_v46 = vpop.xlane.xlu0 %373  ;;  %406 = vadd.xlane.f32.xlu1 %v405_v35  ;;  %522 = vadd.xlane.f32.xlu0 %v521_v42  ;;  %v662_v16 = vld [vmem:[%s4589_s2 + $0x98] sm:$0xff] }
  0xb3   : > { %v494_v48 = vmul.f32 0.03125, %v487_v43  ;;  %v381_v49 = vmul.f32 0.03125, %v374_v46  ;;  %v507_v50 = vmul.f32 %v3529_v41, %v3529_v41  ;;  %v394_v20 = vmul.f32 %v3532_v17, %v3532_v17  ;;  %708 = vmatprep.subr.mxu0 %v666_v37  ;;  %v653_v37 = vld [vmem:[%s4589_s2 + $0x50] sm:$0xff] }
  0xb4   : > { %709 = vmatpush1.msra.mxu0 %v665_v39 }
  0xb5   : > { %v3541_v51 = vsub.f32 %v3426_v24, %v494_v48  ;;  %v3544_v21 = vsub.f32 %v3429_v25, %v381_v49  ;;  %v524_v54 = vsel %vm230_vm0, %v507_v50, 0.0  ;;  %v411_v57 = vsel %vm230_vm0, %v394_v20, 0.0 }
  0xb6   : > { %409 = vadd.xlane.f32.xlu1 %v408_v47  ;;  %v236_v55 = vpop.xlane.xlu1 %235  ;;  %525 = vadd.xlane.f32.xlu0 %v524_v54  ;;  %v233_v56 = vpop.xlane.xlu0 %232 }
  0xb7   : > { %v255_v58 = vmul.f32 0.03125, %v236_v55  ;;  %v254_v59 = vmul.f32 0.03125, %v233_v56  ;;  %v508_v60 = vmul.f32 %v3541_v51, %v3541_v51  ;;  %v395_v24 = vmul.f32 %v3544_v21, %v3544_v21 }
  0xb9   : > { %v3553_v61 = vsub.f32 %v3436_v28, %v255_v58  ;;  %v3556_v25 = vsub.f32 %v3439_v29, %v254_v59  ;;  %v527_v1 = vsel %vm249_vm1, %v508_v60, 0.0  ;;  %v414_v4 = vsel %vm249_vm1, %v395_v24, 0.0 }
  0xba   : > { %412 = vadd.xlane.f32.xlu1 %v411_v57  ;;  %v242_v2 = vpop.xlane.xlu1 %241  ;;  %528 = vadd.xlane.f32.xlu0 %v527_v1  ;;  %v239_v3 = vpop.xlane.xlu0 %238 }
  0xbb   : > { %v257_v5 = vmul.f32 0.03125, %v242_v2  ;;  %v256_v6 = vmul.f32 0.03125, %v239_v3  ;;  %v269_v7 = vmul.f32 %v3553_v61, %v3553_v61  ;;  %v268_v28 = vmul.f32 %v3556_v25, %v3556_v25 }
  0xbd   : > { %v3565_v8 = vsub.f32 %v3446_v32, %v257_v5  ;;  %v3568_v29 = vsub.f32 %v3449_v33, %v256_v6  ;;  %v278_v9 = vsel %vm230_vm0, %v269_v7, 0.0  ;;  %v275_v19 = vsel %vm230_vm0, %v268_v28, 0.0  ;;  %v660_v5 = vld [vmem:[%s4589_s2 + $0x88] sm:$0xff]  ;;  %v659_v6 = vld [vmem:[%s4589_s2 + $0x80] sm:$0xff]  ;;  %v658_v28 = vld [vmem:[%s4589_s2 + $0x78] sm:$0xff] }
  0xbe   : > { %415 = vadd.xlane.f32.xlu1 %v414_v4  ;;  %279 = vadd.xlane.f32.xlu0 %v278_v9  ;;  %v245_v14 = vpop.xlane.xlu0 %244  ;;  %v661_v4 = vld [vmem:[%s4589_s2 + $0x90] sm:$0xff] }
  0xbf   : > { %v258_v15 = vmul.f32 0.03125, %v245_v14  ;;  %v271_v18 = vmul.f32 %v3565_v8, %v3565_v8  ;;  %v270_v22 = vmul.f32 %v3568_v29, %v3568_v29  ;;  %v657_v14 = vld [vmem:[%s4589_s2 + $0x70] sm:$0xff] }
  0xc1   : > { %v3577_v32 = vsub.f32 %v3456_v36, %v258_v15  ;;  %v284_v33 = vsel %vm230_vm0, %v271_v18, 0.0  ;;  %v281_v12 = vsel %vm230_vm0, %v270_v22, 0.0  ;;  %v656_v22 = vld [vmem:[%s4589_s2 + $0x68] sm:$0xff] }
  0xc2   : > { %285 = vadd.xlane.f32.xlu0 %v284_v33  ;;  %276 = vadd.xlane.f32.xlu1 %v275_v19  ;;  %v248_v23 = vpop.xlane.xlu0 %247 }
  0xc3   : > { %v259_v26 = vmul.f32 0.03125, %v248_v23  ;;  %v272_v30 = vmul.f32 %v3577_v32, %v3577_v32 }
  0xc5   : > { %v3584_v31 = vsub.f32 %v3461_v38, %v259_v26  ;;  %v287_v34 = vsel %vm230_vm0, %v272_v30, 0.0  ;;  %v664_v38 = vld [vmem:[%s4589_s2 + $0xa8] sm:$0xff]  ;;  %v655_v26 = vld [vmem:[%s4589_s2 + $0x60] sm:$0xff]  ;;  %v654_v30 = vld [vmem:[%s4589_s2 + $0x58] sm:$0xff] }
  0xc6   : > { %282 = vadd.xlane.f32.xlu1 %v281_v12  ;;  %710 = vmatprep.subr.mxu0 %v664_v38 }
  0xc7   : > { %v273_v36 = vmul.f32 %v3584_v31, %v3584_v31  ;;  %711 = vmatpush1.msra.mxu0 %v663_v40 }
  0xc8   : > { %712 = vmatprep.subr.mxu0 %v662_v16  ;;  %v652_v16 = vld [vmem:[%s4589_s2 + $0x48] sm:$0xff] }
  0xc9   : > { %v290_v35 = vsel %vm230_vm0, %v273_v36, 0.0  ;;  %713 = vmatpush1.msra.mxu0 %v661_v4 }
  0xca   : > { %288 = vadd.xlane.f32.xlu1 %v287_v34  ;;  %291 = vadd.xlane.f32.xlu0 %v290_v35  ;;  %v3638_v35 = vld [vmem:[%s4590_s3] ss:$0 sm:$0xff] }
  0xcb   : > { %714 = vmatprep.subr.mxu0 %v660_v5  ;;  %v647_v5 = vld [vmem:[%s4589_s2 + $0x20] sm:$0xff] }
  0xcc   : > { %715 = vmatpush1.msra.mxu0 %v659_v6 }
  0xcd   : > { %716 = vmatprep.subr.mxu0 %v658_v28 }
  0xce   : > { %717 = vmatpush1.msra.mxu0 %v657_v14 }
  0xcf   : > { %718 = vmatprep.subr.mxu0 %v656_v22 }
  0xd0   : > { %719 = vmatpush1.msra.mxu0 %v655_v26 }
  0xd1   : > { %720 = vmatprep.subr.mxu0 %v654_v30 }
  0xd2   : > { %721 = vmatpush1.msra.mxu0 %v653_v37 }
  0xd3   : > { %722 = vmatprep.subr.mxu0 %v652_v16 }
 0x12b   : > { %v398_v42 = vpop.xlane.xlu1 %397  ;;  %v401_v43 = vpop.xlane.xlu0 %400 }
 0x12c   : > { %v417_v46 = vmul.f32 0.03125, %v398_v42  ;;  %v418_v47 = vmul.f32 0.03125, %v401_v43 }
 0x12e   : > { %v424_v48 = vadd.f32 1e-05, %v417_v46  ;;  %v425_v54 = vadd.f32 1e-05, %v418_v47  ;;  %v3650_v46 = vld [vmem:[%s4590_s3 + $0x1] ss:$0 sm:$0xff] }
 0x12f   : > { %v511_v49 = vpop.xlane.xlu1 %510  ;;  %v514_v50 = vpop.xlane.xlu0 %513  ;;  %v651_v47 = vld [vmem:[%s4589_s2 + $0x40] sm:$0xff] }
 0x130   : > { %3144 = vrsqrt.f32 %v424_v48  ;;  %v530_v20 = vmul.f32 0.03125, %v511_v49  ;;  %v531_v55 = vmul.f32 0.03125, %v514_v50  ;;  %v650_v49 = vld [vmem:[%s4589_s2 + $0x38] sm:$0xff]  ;;  %723 = vmatpush1.msra.mxu0 %v651_v47 }
 0x131   : > { %724 = vmatprep.subr.mxu0 %v650_v49 }
 0x132   : > { %v537_v56 = vadd.f32 1e-05, %v530_v20  ;;  %v538_v60 = vadd.f32 1e-05, %v531_v55 }
 0x133   : > { %v252_v57 = vpop.xlane.xlu1 %251  ;;  %v517_v58 = vpop.xlane.xlu0 %516 }
 0x134   : > { %3146 = vrsqrt.f32 %v537_v56  ;;  %v260_v59 = vmul.f32 0.03125, %v252_v57  ;;  %v532_v1 = vmul.f32 0.03125, %v517_v58 }
 0x135   : > { %3148 = vrsqrt.f32 %v425_v54 }
 0x136   : > { %v3606_v24 = vsub.f32 %v3488_v62, %v260_v59  ;;  %3150 = vrsqrt.f32 %v538_v60  ;;  %v539_v15 = vadd.f32 1e-05, %v532_v1  ;;  %v649_v1 = vld [vmem:[%s4589_s2 + $0x30] sm:$0xff] }
 0x137   : > { %v404_v2 = vpop.xlane.xlu1 %403  ;;  %v520_v3 = vpop.xlane.xlu0 %519  ;;  %725 = vmatpush1.msra.mxu0 %v649_v1 }
 0x138   : > { %v419_v7 = vmul.f32 0.03125, %v404_v2  ;;  %v274_v62 = vmul.f32 %v3606_v24, %v3606_v24  ;;  %v533_v9 = vmul.f32 0.03125, %v520_v3  ;;  %v648_v2 = vld [vmem:[%s4589_s2 + $0x28] sm:$0xff] }
 0x139   : > { %726 = vmatprep.subr.mxu0 %v648_v2 }
 0x13a   : > { %v426_v18 = vadd.f32 1e-05, %v419_v7  ;;  %v293_v19 = vsel %vm249_vm1, %v274_v62, 0.0  ;;  %v540_v36 = vadd.f32 1e-05, %v533_v9  ;;  %727 = vmatpush1.msra.mxu0 %v647_v5  ;;  %v646_v9 = vld [vmem:[%s4589_s2 + $0x18] sm:$0xff] }
 0x13b   : > { %v407_v33 = vpop.xlane.xlu1 %406  ;;  %294 = vadd.xlane.f32.xlu1 %v293_v19  ;;  %v523_v23 = vpop.xlane.xlu0 %522  ;;  %728 = vmatprep.subr.mxu0 %v646_v9 }
 0x13c   : > { %3152 = vrsqrt.f32 %v426_v18  ;;  %v420_v12 = vmul.f32 0.03125, %v407_v33  ;;  %v534_v38 = vmul.f32 0.03125, %v523_v23  ;;  %v644_v18 = vld [vmem:[%s4589_s2 + $0x8] sm:$0xff]  ;;  %v643_v23 = vld [vmem:[%s4589_s2] sm:$0xff] }
 0x13d   : > { %v3145_v34 = vpop.eup %3144  ;;  %3154 = vrsqrt.f32 %v539_v15 }
 0x13e   : > { %v427_v39 = vadd.f32 1e-05, %v420_v12  ;;  %v438_v40 = vmul.f32 %v3145_v34, %v3469_v45  ;;  %v541_v55 = vadd.f32 1e-05, %v534_v38 }
 0x13f   : > { %v410_v42 = vpop.xlane.xlu1 %409  ;;  %v526_v43 = vpop.xlane.xlu0 %525 }
 0x140   : > { %3156 = vrsqrt.f32 %v427_v39  ;;  %v421_v48 = vmul.f32 0.03125, %v410_v42  ;;  %v445_v45 = vmul.f32 %v3638_v35, %v438_v40  ;;  %v535_v20 = vmul.f32 0.03125, %v526_v43 }
 0x141   : > { %v3147_v50 = vpop.eup %3146  ;;  %3158 = vrsqrt.f32 %v540_v36  ;;  %v4592_v36 = vmov 0.0  }
 0x142   : > { %v3149_v54 = vpop.eup %3148  ;;  %v428_v56 = vadd.f32 1e-05, %v421_v48  ;;  %v452_v57 = vadd.f32 %v3650_v46, %v445_v45  ;;  %v551_v58 = vmul.f32 %v3147_v50, %v3479_v53  ;;  %v542_v4 = vadd.f32 1e-05, %v535_v20  ;;  %764 = vmatprep.mubr.f32.mxu0 %v4592_v36  ;;  %2828 = vmatprep.subr.mxu1 %v4592_v36 }
 0x143   : > { %v413_v59 = vpop.xlane.xlu1 %412  ;;  %v529_v60 = vpop.xlane.xlu0 %528  ;;  %v439_v53 = vmul.f32 %v3149_v54, %v3466_v44  ;;  %v645_v44 = vld [vmem:[%s4589_s2 + $0x10] sm:$0xff]  ;;  %2842 = vmatprep.mubr.msk.f32.mxu1 %vm3318_vm4, %v4592_v36 }
 0x144   : > { %3160 = vrsqrt.f32 %v428_v56  ;;  %v422_v3 = vmul.f32 0.03125, %v413_v59  ;;  %579 = vrot.lane.b32.xlu0 %v452_v57, %s3313_s14  ;;  %v3151_v6 = vpop.eup %3150  ;;  %v536_v62 = vmul.f32 0.03125, %v529_v60  ;;  %v558_v28 = vmul.f32 %v3638_v35, %v551_v58  ;;  %729 = vmatpush1.msra.mxu0 %v645_v44 }
 0x145   : > { %3162 = vrsqrt.f32 %v541_v55  ;;  %v446_v22 = vmul.f32 %v3638_v35, %v439_v53  ;;  %v552_v33 = vmul.f32 %v3151_v6, %v3476_v52  ;;  %730 = vmatprep.subr.mxu0 %v644_v18 }
 0x146   : > { %v429_v7 = vadd.f32 1e-05, %v422_v3  ;;  %v543_v26 = vadd.f32 1e-05, %v536_v62  ;;  %v565_v30 = vadd.f32 %v3650_v46, %v558_v28  ;;  %731 = vmatpush1.msra.mxu0 %v643_v23 }
 0x147   : > { %v416_v14 = vpop.xlane.xlu1 %415  ;;  %2863 = vmatprep.subr.mxu0 %v4592_v36  ;;  %v453_v38 = vadd.f32 %v3650_v46, %v446_v22  ;;  %v280_v18 = vpop.xlane.xlu0 %279 }
 0x148   : > { %3164 = vrsqrt.f32 %v429_v7  ;;  %v423_v15 = vmul.f32 0.03125, %v416_v14 }
 0x149   : > { %v3153_v19 = vpop.eup %3152  ;;  %3166 = vrsqrt.f32 %v542_v4 }
 0x14a   : > { %v430_v12 = vadd.f32 1e-05, %v423_v15  ;;  %v440_v34 = vmul.f32 %v3153_v19, %v3494_v0  ;;  %v3155_v37 = vpop.eup %3154  ;;  %v559_v0 = vmul.f32 %v3638_v35, %v552_v33  ;;  %v297_v19 = vmul.f32 0.03125, %v280_v18 }
 0x14b   : > { %v553_v43 = vmul.f32 %v3155_v37, %v3491_v63  ;;  %v277_v14 = vpop.xlane.xlu1 %276  ;;  %v286_v23 = vpop.xlane.xlu0 %285 }
 0x14c   : > { %3168 = vrsqrt.f32 %v430_v12  ;;  %607 = vrot.lane.b32.xlu1 %v565_v30, %s3315_s28  ;;  %v447_v52 = vmul.f32 %v3638_v35, %v440_v34  ;;  %v566_v50 = vadd.f32 %v3650_v46, %v559_v0  ;;  %v296_v44 = vmul.f32 0.03125, %v277_v14 }
 0x14d   : > { %v3157_v39 = vpop.eup %3156  ;;  %3170 = vrsqrt.f32 %v543_v26  ;;  %v560_v54 = vmul.f32 %v3638_v35, %v553_v43  ;;  %v304_v22 = vadd.f32 1e-05, %v297_v19  ;;  %v299_v26 = vmul.f32 0.03125, %v286_v23 }
 0x14e   : > { %v3159_v40 = vpop.eup %3158  ;;  %v454_v16 = vadd.f32 %v3650_v46, %v447_v52  ;;  %v441_v42 = vmul.f32 %v3157_v39, %v3508_v11  ;;  %v303_v15 = vadd.f32 1e-05, %v296_v44 }
 0x14f   : > { %v554_v45 = vmul.f32 %v3159_v40, %v3505_v10  ;;  %v567_v58 = vadd.f32 %v3650_v46, %v560_v54  ;;  %v306_v34 = vadd.f32 1e-05, %v299_v26 }
 0x150   : > { %583 = vrot.lane.b32.xlu0 %v454_v16, %s3313_s14  ;;  %581 = vrot.lane.b32.xlu1 %v453_v38, %s3313_s14  ;;  %v448_v47 = vmul.f32 %v3638_v35, %v441_v42  ;;  %3172 = vrsqrt.f32 %v303_v15 }
 0x151   : > { %v3161_v48 = vpop.eup %3160  ;;  %v561_v56 = vmul.f32 %v3638_v35, %v554_v45  ;;  %3174 = vrsqrt.f32 %v304_v22 }
 0x152   : > { %v455_v49 = vadd.f32 %v3650_v46, %v448_v47  ;;  %v442_v20 = vmul.f32 %v3161_v48, %v3520_v13  ;;  %v3163_v11 = vpop.eup %3162 }
 0x153   : > { %v555_v13 = vmul.f32 %v3163_v11, %v3517_v27  ;;  %v568_v2 = vadd.f32 %v3650_v46, %v561_v56  ;;  %v292_v39 = vpop.xlane.xlu0 %291 }
 0x154   : > { %585 = vrot.lane.b32.xlu0 %v455_v49, %s3313_s14  ;;  %609 = vrot.lane.b32.xlu1 %v566_v50, %s3315_s28  ;;  %v449_v63 = vmul.f32 %v3638_v35, %v442_v20  ;;  %v301_v0 = vmul.f32 0.03125, %v292_v39  ;;  %v668_v39 = vlaneseq }
 0x155   : > { %v3165_v55 = vpop.eup %3164  ;;  %v562_v53 = vmul.f32 %v3638_v35, %v555_v13 }
 0x156   : > { %v3167_v57 = vpop.eup %3166  ;;  %v456_v10 = vadd.f32 %v3650_v46, %v449_v63  ;;  %v443_v59 = vmul.f32 %v3165_v55, %v3532_v17  ;;  %v308_v16 = vadd.f32 1e-05, %v301_v0 }
 0x157   : > { %v556_v5 = vmul.f32 %v3167_v57, %v3529_v41  ;;  %v569_v7 = vadd.f32 %v3650_v46, %v562_v53 }
 0x158   : > { %587 = vrot.lane.b32.xlu0 %v456_v10, %s3313_s14  ;;  %611 = vrot.lane.b32.xlu1 %v567_v58, %s3315_s28  ;;  %v450_v60 = vmul.f32 %v3638_v35, %v443_v59 }
 0x159   : > { %v3169_v1 = vpop.eup %3168  ;;  %v563_v62 = vmul.f32 %v3638_v35, %v556_v5 }
 0x15a   : > { %v457_v3 = vadd.f32 %v3650_v46, %v450_v60  ;;  %v444_v4 = vmul.f32 %v3169_v1, %v3544_v21  ;;  %v3171_v17 = vpop.eup %3170 }
 0x15b   : > { %v557_v28 = vmul.f32 %v3171_v17, %v3541_v51  ;;  %v570_v41 = vadd.f32 %v3650_v46, %v563_v62  ;;  %v283_v51 = vpop.xlane.xlu1 %282 }
 0x15c   : > { %589 = vrot.lane.b32.xlu0 %v457_v3, %s3313_s14  ;;  %613 = vrot.lane.b32.xlu1 %v568_v2, %s3315_s28  ;;  %v451_v27 = vmul.f32 %v3638_v35, %v444_v4  ;;  %v298_v33 = vmul.f32 0.03125, %v283_v51 }
 0x15d   : > { %v564_v21 = vmul.f32 %v3638_v35, %v557_v28  ;;  %v3173_v52 = vpop.eup %3172 }
 0x15e   : > { %v458_v6 = vadd.f32 %v3650_v46, %v451_v27  ;;  %v305_v12 = vadd.f32 1e-05, %v298_v33  ;;  %v317_v40 = vmul.f32 %v3173_v52, %v3556_v25  ;;  %v3175_v43 = vpop.eup %3174 }
 0x15f   : > { %v571_v9 = vadd.f32 %v3650_v46, %v564_v21  ;;  %v289_v30 = vpop.xlane.xlu1 %288  ;;  %v318_v50 = vmul.f32 %v3175_v43, %v3553_v61 }
 0x160   : > { %591 = vrot.lane.b32.xlu0 %v458_v6, %s3313_s14  ;;  %615 = vrot.lane.b32.xlu1 %v569_v7, %s3315_s28  ;;  %3176 = vrsqrt.f32 %v305_v12  ;;  %v300_v37 = vmul.f32 0.03125, %v289_v30  ;;  %v328_v42 = vmul.f32 %v3638_v35, %v317_v40 }
 0x161   : > { %3178 = vrsqrt.f32 %v306_v34  ;;  %v329_v56 = vmul.f32 %v3638_v35, %v318_v50 }
 0x162   : > { %v307_v38 = vadd.f32 1e-05, %v300_v37  ;;  %v339_v49 = vadd.f32 %v3650_v46, %v328_v42 }
 0x163   : > { %v340_v13 = vadd.f32 %v3650_v46, %v329_v56 }
 0x164   : > { %617 = vrot.lane.b32.xlu1 %v570_v41, %s3315_s28  ;;  %3180 = vrsqrt.f32 %v307_v38  ;;  %v669_v38 = vshrl.u32 %v668_v39, 7 }
 0x165   : > { %3182 = vrsqrt.f32 %v308_v16 }
 0x166   : > { %v674_v0 = vsub.s32 1, %v669_v38 }
 0x168   : > { %619 = vrot.lane.b32.xlu1 %v571_v9, %s3315_s28 }
 0x16d   : > { %v3177_v20 = vpop.eup %3176 }
 0x16e   : > { %v319_v55 = vmul.f32 %v3177_v20, %v3568_v29  ;;  %v3179_v57 = vpop.eup %3178 }
 0x16f   : > { %v320_v59 = vmul.f32 %v3179_v57, %v3565_v8 }
 0x170   : > { %v330_v58 = vmul.f32 %v3638_v35, %v319_v55 }
 0x171   : > { %v3181_v60 = vpop.eup %3180  ;;  %v331_v53 = vmul.f32 %v3638_v35, %v320_v59 }
 0x172   : > { %v341_v4 = vadd.f32 %v3650_v46, %v330_v58  ;;  %v321_v5 = vmul.f32 %v3181_v60, %v3577_v32  ;;  %v3183_v17 = vpop.eup %3182 }
 0x173   : > { %v342_v62 = vadd.f32 %v3650_v46, %v331_v53  ;;  %v322_v41 = vmul.f32 %v3183_v17, %v3584_v31 }
 0x174   : > { %v332_v28 = vmul.f32 %v3638_v35, %v321_v5 }
 0x175   : > { %v333_v18 = vmul.f32 %v3638_v35, %v322_v41 }
 0x176   : > { %v343_v15 = vadd.f32 %v3650_v46, %v332_v28 }
 0x1b6   : > { %v580_v48 = vpop.permute.xlu0 %579 }
 0x1b7   : > { %v628_v11 = vsel %vm230_vm0, %v339_v49, %v580_v48 }
 0x1c2   : > { %v584_v10 = vpop.permute.xlu0 %583 }
 0x1c3   : > { %v630_v8 = vsel %vm230_vm0, %v341_v4, %v584_v10 }
 0x1c4   : > { %v295_v47 = vpop.xlane.xlu1 %294 }
 0x1c5   : > { %v302_v45 = vmul.f32 0.03125, %v295_v47 }
 0x1c6   : > { %v586_v29 = vpop.permute.xlu0 %585 }
 0x1c7   : > { %v309_v54 = vadd.f32 1e-05, %v302_v45  ;;  %v631_v21 = vsel %vm230_vm0, %v342_v62, %v586_v29 }
 0x1c8   : > { %v608_v25 = vpop.permute.xlu1 %607 }
 0x1c9   : > { %3184 = vrsqrt.f32 %v309_v54  ;;  %v636_v63 = vsel %vm635_vm2, %v628_v11, %v608_v25  ;;  %v670_v25 = vsub.s32 0, %v669_v38 }
 0x1ca   : > { %2548 = vmatmul.mubr.msk.f32.vlgmr.msra.gmra.mxu0 %vm678_vm3, %v636_v63  ;;  %v588_v32 = vpop.permute.xlu0 %587 }
 0x1cb   : > { %770 = vmatprep.mubr.f32.mxu0 %v4592_v36  ;;  %v632_v31 = vsel %vm230_vm0, %v343_v15, %v588_v32 }
 0x1cc   : > { %v582_v61 = vpop.permute.xlu1 %581 }
 0x1cd   : > { %v629_v1 = vsel %vm230_vm0, %v340_v13, %v582_v61 }
 0x1ce   : > { %v590_v22 = vpop.permute.xlu0 %589 }
 0x1d0   : > { %v610_v2 = vpop.permute.xlu1 %609 }
 0x1d1   : > { %v637_v3 = vsel %vm635_vm2, %v629_v1, %v610_v2 }
 0x1d2   : > { %2549 = vmatmul.mubr.msk.f32.gmra.mxu0 %vm678_vm3, %v637_v3 }
 0x1d3   : > { %776 = vmatprep.mubr.f32.mxu0 %v4592_v36 }
 0x1d4   : > { %v612_v27 = vpop.permute.xlu1 %611 }
 0x1d5   : > { %v638_v6 = vsel %vm635_vm2, %v630_v8, %v612_v27 }
 0x1d6   : > { %v3185_v7 = vpop.eup %3184  ;;  %2550 = vmatmul.mubr.msk.f32.gmra.mxu0 %vm678_vm3, %v638_v6 }
 0x1d7   : > { %782 = vmatprep.mubr.f32.mxu0 %v4592_v36  ;;  %v323_v9 = vmul.f32 %v3185_v7, %v3606_v24  ;;  %v344_v24 = vadd.f32 %v3650_v46, %v333_v18 }
 0x1d8   : > { %v614_v14 = vpop.permute.xlu1 %613 }
 0x1d9   : > { %v639_v44 = vsel %vm635_vm2, %v631_v21, %v614_v14  ;;  %v334_v19 = vmul.f32 %v3638_v35, %v323_v9  ;;  %v633_v23 = vsel %vm230_vm0, %v344_v24, %v590_v22  ;;  %v592_v35 = vpop.permute.xlu0 %591 }
 0x1da   : > { %2551 = vmatmul.mubr.msk.f32.gmra.mxu0 %vm678_vm3, %v639_v44 }
 0x1db   : > { %788 = vmatprep.mubr.f32.mxu0 %v4592_v36  ;;  %v345_v26 = vadd.f32 %v3650_v46, %v334_v19  ;;  %v2531_v46 = vld [vmem:[%s4590_s3 + $0x2] ss:$4 sm:$0x3] }
 0x1dc   : > { %v616_v51 = vpop.permute.xlu1 %615  ;;  %v3788_v40 = vrot.slane %v2531_v46, %v674_v0  ;;  %v671_v57 = vrot.slane %v2531_v46, %v670_v25 }
 0x1dd   : > { %v640_v33 = vsel %vm635_vm2, %v632_v31, %v616_v51  ;;  %v634_v34 = vsel %vm230_vm0, %v345_v26, %v592_v35 }
 0x1de   : > { %2552 = vmatmul.mubr.msk.f32.gmra.mxu0 %vm678_vm3, %v640_v33 }
 0x1df   : > { %794 = vmatprep.mubr.f32.mxu0 %v4592_v36 }
 0x1e0   : > { %v618_v12 = vpop.permute.xlu1 %617 }
 0x1e1   : > { %v641_v30 = vsel %vm635_vm2, %v633_v23, %v618_v12 }
 0x1e2   : > { %2553 = vmatmul.mubr.msk.f32.gmra.mxu0 %vm678_vm3, %v641_v30 }
 0x1e3   : > { %800 = vmatprep.mubr.f32.mxu0 %v4592_v36 }
 0x1e4   : > { %v620_v37 = vpop.permute.xlu1 %619 }
 0x1e5   : > { %v642_v52 = vsel %vm635_vm2, %v634_v34, %v620_v37 }
 0x1e6   : > { %2554 = vmatmul.mubr.msk.f32.gmra.mxu0 %vm678_vm3, %v642_v52 }
 0x1e7   : > { %2877 = vmatprep.mubr.msk.f32.mxu0 %vm3318_vm4, %v4592_v36 }
 0x28a   : > { %v766_v16 = vpop.f32.mrf.mxu0 }
 0x28b   : > { %v3833_v53 = vadd.f32 %v766_v16, %v671_v57 }
 0x28c   : > { %v768_v42 = vpop.f32.mrf.mxu0 }
 0x28d   : > { %v3791_v43 = vadd.f32 %v768_v42, %v3788_v40 }
 0x292   : > { %v772_v47 = vpop.f32.mrf.mxu0 }
 0x293   : > { %v3820_v29 = vadd.f32 %v772_v47, %v671_v57 }
 0x294   : > { %v774_v48 = vpop.f32.mrf.mxu0 }
 0x295   : > { %v3794_v45 = vadd.f32 %v774_v48, %v3788_v40 }
 0x296   : > { %v778_v49 = vpop.f32.mrf.mxu0 }
 0x297   : > { %v3828_v4 = vadd.f32 %v778_v49, %v671_v57 }
 0x298   : > { %v780_v50 = vpop.f32.mrf.mxu0 }
 0x299   : > { %v3797_v20 = vadd.f32 %v780_v50, %v3788_v40 }
 0x29a   : > { %v784_v54 = vpop.f32.mrf.mxu0 }
 0x29b   : > { %v3812_v1 = vadd.f32 %v784_v54, %v671_v57 }
 0x29c   : > { %v786_v11 = vpop.f32.mrf.mxu0 }
 0x29d   : > { %v3800_v63 = vadd.f32 %v786_v11, %v3788_v40 }
 0x29e   : > { %v790_v55 = vpop.f32.mrf.mxu0 }
 0x29f   : > { %v3822_v3 = vadd.f32 %v790_v55, %v671_v57 }
 0x2a0   : > { %v792_v56 = vpop.f32.mrf.mxu0 }
 0x2a1   : > { %v3803_v10 = vadd.f32 %v792_v56, %v3788_v40 }
 0x2a2   : > { %v796_v61 = vpop.f32.mrf.mxu0 }
 0x2a3   : > { %v3805_v58 = vadd.f32 %v796_v61, %v671_v57 }
 0x2a4   : > { %v798_v59 = vpop.f32.mrf.mxu0 }
 0x2a5   : > { %v3808_v13 = vadd.f32 %v798_v59, %v3788_v40  ;;  %828 = vrot.lane.b32.xlu1 %v3805_v58, %s3316_s5 }
 0x2a6   : > { %v802_v60 = vpop.f32.mrf.mxu0 }
 0x2a7   : > { %v3814_v2 = vadd.f32 %v802_v60, %v671_v57 }
 0x2a9   : > { %824 = vrot.lane.b32.xlu1 %v3812_v1, %s3316_s5  ;;  %830 = vrot.lane.b32.xlu0 %v3814_v2, %s3316_s5 }
 0x2ad   : > { %820 = vrot.lane.b32.xlu1 %v3820_v29, %s3316_s5  ;;  %826 = vrot.lane.b32.xlu0 %v3822_v3, %s3316_s5 }
 0x2b1   : > { %1245 = vrot.lane.b32.xlu1 %v3814_v2, %s3317_s6  ;;  %822 = vrot.lane.b32.xlu0 %v3828_v4, %s3316_s5 }
 0x2b5   : > { %1241 = vrot.lane.b32.xlu1 %v3822_v3, %s3317_s6  ;;  %818 = vrot.lane.b32.xlu0 %v3833_v53, %s3316_s5 }
 0x2b9   : > { %1237 = vrot.lane.b32.xlu1 %v3828_v4, %s3317_s6  ;;  %1243 = vrot.lane.b32.xlu0 %v3805_v58, %s3317_s6 }
 0x2bd   : > { %1233 = vrot.lane.b32.xlu1 %v3833_v53, %s3317_s6  ;;  %1239 = vrot.lane.b32.xlu0 %v3812_v1, %s3317_s6 }
 0x2c1   : > { %1657 = vrot.lane.b32.xlu1 %v3814_v2, %s3319_s7  ;;  %1235 = vrot.lane.b32.xlu0 %v3820_v29, %s3317_s6 }
 0x2c5   : > { %1655 = vrot.lane.b32.xlu1 %v3805_v58, %s3319_s7  ;;  %1219 = vrot.lane.b32.xlu0 %v3833_v53, %s3320_s8 }
 0x2c9   : > { %1653 = vrot.lane.b32.xlu1 %v3822_v3, %s3319_s7  ;;  %1221 = vrot.lane.b32.xlu0 %v3820_v29, %s3320_s8 }
 0x2cd   : > { %1651 = vrot.lane.b32.xlu1 %v3812_v1, %s3319_s7  ;;  %1223 = vrot.lane.b32.xlu0 %v3828_v4, %s3320_s8 }
 0x2d1   : > { %1649 = vrot.lane.b32.xlu1 %v3828_v4, %s3319_s7  ;;  %1225 = vrot.lane.b32.xlu0 %v3812_v1, %s3320_s8 }
 0x2d5   : > { %1647 = vrot.lane.b32.xlu1 %v3820_v29, %s3319_s7  ;;  %1227 = vrot.lane.b32.xlu0 %v3822_v3, %s3320_s8 }
 0x2d9   : > { %1645 = vrot.lane.b32.xlu1 %v3833_v53, %s3319_s7  ;;  %1229 = vrot.lane.b32.xlu0 %v3805_v58, %s3320_s8 }
 0x2dd   : > { %2050 = vrot.lane.b32.xlu1 %v3814_v2, %s3321_s9  ;;  %1231 = vrot.lane.b32.xlu0 %v3814_v2, %s3320_s8 }
 0x2e1   : > { %2048 = vrot.lane.b32.xlu1 %v3805_v58, %s3321_s9  ;;  %1631 = vrot.lane.b32.xlu0 %v3833_v53, %s3322_s10 }
 0x2e5   : > { %2046 = vrot.lane.b32.xlu1 %v3822_v3, %s3321_s9  ;;  %1633 = vrot.lane.b32.xlu0 %v3820_v29, %s3322_s10 }
 0x2e9   : > { %2044 = vrot.lane.b32.xlu1 %v3812_v1, %s3321_s9  ;;  %1635 = vrot.lane.b32.xlu0 %v3828_v4, %s3322_s10 }
 0x2ed   : > { %2042 = vrot.lane.b32.xlu1 %v3828_v4, %s3321_s9  ;;  %1637 = vrot.lane.b32.xlu0 %v3812_v1, %s3322_s10 }
 0x2f1   : > { %2040 = vrot.lane.b32.xlu1 %v3820_v29, %s3321_s9  ;;  %1639 = vrot.lane.b32.xlu0 %v3822_v3, %s3322_s10 }
 0x2f5   : > { %2038 = vrot.lane.b32.xlu1 %v3833_v53, %s3321_s9  ;;  %1641 = vrot.lane.b32.xlu0 %v3805_v58, %s3322_s10 }
 0x2f9   : > { %2026 = vrot.lane.b32.xlu1 %v3820_v29, %s3323_s11  ;;  %1643 = vrot.lane.b32.xlu0 %v3814_v2, %s3322_s10 }
 0x2fd   : > { %2030 = vrot.lane.b32.xlu1 %v3812_v1, %s3323_s11  ;;  %2024 = vrot.lane.b32.xlu0 %v3833_v53, %s3323_s11 }
 0x301   : > { %2034 = vrot.lane.b32.xlu1 %v3805_v58, %s3323_s11  ;;  %2028 = vrot.lane.b32.xlu0 %v3828_v4, %s3323_s11 }
 0x305   : > { %1076 = vrot.lane.b32.xlu1 %v3822_v3, %s3315_s28  ;;  %2032 = vrot.lane.b32.xlu0 %v3822_v3, %s3323_s11 }
 0x309   : > { %1070 = vrot.lane.b32.xlu1 %v3820_v29, %s3315_s28  ;;  %2036 = vrot.lane.b32.xlu0 %v3814_v2, %s3323_s11 }
 0x30d   : > { %1489 = vrot.lane.b32.xlu1 %v3822_v3, %s3313_s14  ;;  %1078 = vrot.lane.b32.xlu0 %v3805_v58, %s3315_s28 }
 0x311   : > { %1483 = vrot.lane.b32.xlu1 %v3820_v29, %s3313_s14  ;;  %1074 = vrot.lane.b32.xlu0 %v3812_v1, %s3315_s28 }
 0x315   : > { %1080 = vrot.lane.b32.xlu1 %v3814_v2, %s3315_s28  ;;  %1072 = vrot.lane.b32.xlu0 %v3828_v4, %s3315_s28 }
 0x317   : > { %v829_v5 = vpop.permute.xlu1 %828 }
 0x319   : > { %1493 = vrot.lane.b32.xlu1 %v3814_v2, %s3313_s14  ;;  %1068 = vrot.lane.b32.xlu0 %v3833_v53, %s3315_s28 }
 0x31b   : > { %v825_v17 = vpop.permute.xlu1 %824  ;;  %v831_v8 = vpop.permute.xlu0 %830 }
 0x31c   : > { %2829 = vmatpush3.xpose.msk.msra.mxu1 %vm832_vm5, %v831_v8 }
 0x31d   : > { %1491 = vrot.lane.b32.xlu0 %v3805_v58, %s3313_s14  ;;  %2830 = vmatprep.subr.mxu1 %v4592_v36 }
 0x31f   : > { %v821_v27 = vpop.permute.xlu1 %820  ;;  %v827_v6 = vpop.permute.xlu0 %826 }
 0x320   : > { %2831 = vmatpush3.xpose.msk.msra.mxu1 %vm832_vm5, %v829_v5 }
 0x321   : > { %1487 = vrot.lane.b32.xlu0 %v3812_v1, %s3313_s14  ;;  %2832 = vmatprep.subr.mxu1 %v4592_v36 }
 0x323   : > { %v1246_v7 = vpop.permute.xlu1 %1245  ;;  %v823_v62 = vpop.permute.xlu0 %822 }
 0x324   : > { %2833 = vmatpush3.xpose.msk.msra.mxu1 %vm832_vm5, %v827_v6 }
 0x325   : > { %1485 = vrot.lane.b32.xlu0 %v3828_v4, %s3313_s14  ;;  %2834 = vmatprep.subr.mxu1 %v4592_v36 }
 0x327   : > { %v1242_v28 = vpop.permute.xlu1 %1241  ;;  %v819_v41 = vpop.permute.xlu0 %818 }
 0x328   : > { %2835 = vmatpush3.xpose.msk.msra.mxu1 %vm832_vm5, %v825_v17 }
 0x329   : > { %2836 = vmatprep.subr.mxu1 %v4592_v36 }
 0x32b   : > { %v1238_v32 = vpop.permute.xlu1 %1237  ;;  %v1244_v21 = vpop.permute.xlu0 %1243 }
 0x32c   : > { %2837 = vmatpush3.xpose.msk.msra.mxu1 %vm832_vm5, %v823_v62 }
 0x32d   : > { %2838 = vmatprep.subr.mxu1 %v4592_v36 }
 0x32f   : > { %v1234_v9 = vpop.permute.xlu1 %1233  ;;  %v1240_v14 = vpop.permute.xlu0 %1239 }
 0x330   : > { %2839 = vmatpush3.xpose.msk.msra.mxu1 %vm832_vm5, %v821_v27  ;;  %v2668_v27 = vld [vmem:[%s4074_s18] sm:$0xff]  }
 0x331   : > { %2840 = vmatprep.subr.mxu1 %v4592_v36  ;;  %v2669_v6 = vunpack.c.l.bf16 %v2668_v27 }
 0x333   : > { %v1658_v44 = vpop.permute.xlu1 %1657  ;;  %v1236_v15 = vpop.permute.xlu0 %1235 }
 0x334   : > { %2841 = vmatpush3.xpose.msk.msra.mxu1 %vm832_vm5, %v819_v41 }
 0x335   : > { %2898 = vmatprep.subr.mxu1 %v4592_v36 }
 0x337   : > { %v1656_v18 = vpop.permute.xlu1 %1655  ;;  %2843 = vmatmul.mubr.msk.f32.vlgmr.msra.gmra.mxu1 %vm832_vm5, %v3833_v53  ;;  %v1220_v31 = vpop.permute.xlu0 %1219 }
 0x338   : > { %2899 = vmatpush3.xpose.msk.msra.mxu1 %vm832_vm5, %v1246_v7  ;;  %2845 = vmatprep.mubr.msk.f32.mxu1 %vm3318_vm4, %v4592_v36 }
 0x339   : > { %2900 = vmatprep.subr.mxu1 %v4592_v36 }
 0x33b   : > { %v1654_v19 = vpop.permute.xlu1 %1653  ;;  %2846 = vmatmul.mubr.msk.f32.gmra.mxu1 %vm832_vm5, %v3820_v29  ;;  %v1222_v51 = vpop.permute.xlu0 %1221 }
 0x33c   : > { %2901 = vmatpush3.xpose.msk.msra.mxu1 %vm832_vm5, %v1244_v21  ;;  %2848 = vmatprep.mubr.msk.f32.mxu1 %vm3318_vm4, %v4592_v36 }
 0x33d   : > { %2902 = vmatprep.subr.mxu1 %v4592_v36 }
 0x33f   : > { %v1652_v22 = vpop.permute.xlu1 %1651  ;;  %2849 = vmatmul.mubr.msk.f32.gmra.mxu1 %vm832_vm5, %v3828_v4  ;;  %v1224_v33 = vpop.permute.xlu0 %1223 }
 0x340   : > { %2903 = vmatpush3.xpose.msk.msra.mxu1 %vm832_vm5, %v1242_v28  ;;  %2851 = vmatprep.mubr.msk.f32.mxu1 %vm3318_vm4, %v4592_v36 }
 0x341   : > { %2904 = vmatprep.subr.mxu1 %v4592_v36 }
 0x343   : > { %v1650_v24 = vpop.permute.xlu1 %1649  ;;  %2852 = vmatmul.mubr.msk.f32.gmra.mxu1 %vm832_vm5, %v3812_v1  ;;  %v1226_v23 = vpop.permute.xlu0 %1225 }
 0x344   : > { %2905 = vmatpush3.xpose.msk.msra.mxu1 %vm832_vm5, %v1240_v14  ;;  %2854 = vmatprep.mubr.msk.f32.mxu1 %vm3318_vm4, %v4592_v36 }
 0x345   : > { %2906 = vmatprep.subr.mxu1 %v4592_v36 }
 0x347   : > { %v1648_v26 = vpop.permute.xlu1 %1647  ;;  %2855 = vmatmul.mubr.msk.f32.gmra.mxu1 %vm832_vm5, %v3822_v3  ;;  %v1228_v12 = vpop.permute.xlu0 %1227 }
 0x348   : > { %2907 = vmatpush3.xpose.msk.msra.mxu1 %vm832_vm5, %v1238_v32  ;;  %2857 = vmatprep.mubr.msk.f32.mxu1 %vm3318_vm4, %v4592_v36  ;;  %v2670_v32 = vunpack.c.h.bf16 %v2668_v27 }
 0x349   : > { %2908 = vmatprep.subr.mxu1 %v4592_v36 }
 0x34b   : > { %v1646_v30 = vpop.permute.xlu1 %1645  ;;  %2858 = vmatmul.mubr.msk.f32.gmra.mxu1 %vm832_vm5, %v3805_v58  ;;  %v1230_v35 = vpop.permute.xlu0 %1229 }
 0x34c   : > { %2909 = vmatpush3.xpose.msk.msra.mxu1 %vm832_vm5, %v1236_v15  ;;  %2860 = vmatprep.mubr.msk.f32.mxu1 %vm3318_vm4, %v4592_v36 }
 0x34d   : > { %2910 = vmatprep.subr.mxu1 %v4592_v36 }
 0x34f   : > { %v2051_v34 = vpop.permute.xlu1 %2050  ;;  %2861 = vmatmul.mubr.msk.f32.gmra.mxu1 %vm832_vm5, %v3814_v2  ;;  %v1232_v37 = vpop.permute.xlu0 %1231 }
 0x350   : > { %2911 = vmatpush3.xpose.msk.msra.mxu1 %vm832_vm5, %v1234_v9  ;;  %2912 = vmatprep.mubr.msk.f32.mxu1 %vm3318_vm4, %v4592_v36  ;;  %v2707_v9 = vld [vmem:[%s4074_s18 + $0x8] sm:$0xff]  }
 0x351   : > { %2968 = vmatprep.subr.mxu1 %v4592_v36 }
 0x353   : > { %v2049_v52 = vpop.permute.xlu1 %2048  ;;  %2913 = vmatmul.mubr.msk.f32.vlgmr.msra.gmra.mxu1 %vm832_vm5, %v1220_v31  ;;  %v1632_v39 = vpop.permute.xlu0 %1631  ;;  %v2673_v31 = vunpack.c.l.bf16 %v2707_v9 }
 0x354   : > { %2969 = vmatpush3.xpose.msk.msra.mxu1 %vm832_vm5, %v1658_v44  ;;  %2915 = vmatprep.mubr.msk.f32.mxu1 %vm3318_vm4, %v4592_v36 }
 0x355   : > { %2970 = vmatprep.subr.mxu1 %v4592_v36 }
 0x357   : > { %v2047_v38 = vpop.permute.xlu1 %2046  ;;  %2916 = vmatmul.mubr.msk.f32.gmra.mxu1 %vm832_vm5, %v1222_v51  ;;  %v1634_v0 = vpop.permute.xlu0 %1633 }
 0x358   : > { %2971 = vmatpush3.xpose.msk.msra.mxu1 %vm832_vm5, %v1656_v18  ;;  %2918 = vmatprep.mubr.msk.f32.mxu1 %vm3318_vm4, %v4592_v36 }
 0x359   : > { %2972 = vmatprep.subr.mxu1 %v4592_v36 }
 0x35b   : > { %v2045_v46 = vpop.permute.xlu1 %2044  ;;  %2919 = vmatmul.mubr.msk.f32.gmra.mxu1 %vm832_vm5, %v1224_v33  ;;  %v1636_v16 = vpop.permute.xlu0 %1635 }
 0x35c   : > { %2973 = vmatpush3.xpose.msk.msra.mxu1 %vm832_vm5, %v1654_v19  ;;  %2921 = vmatprep.mubr.msk.f32.mxu1 %vm3318_vm4, %v4592_v36 }
 0x35d   : > { %2974 = vmatprep.subr.mxu1 %v4592_v36 }
 0x35f   : > { %v2043_v42 = vpop.permute.xlu1 %2042  ;;  %2922 = vmatmul.mubr.msk.f32.gmra.mxu1 %vm832_vm5, %v1226_v23  ;;  %v1638_v47 = vpop.permute.xlu0 %1637  ;;  %v2674_v23 = vunpack.c.h.bf16 %v2707_v9  ;;  %v974_v9 = vld [vmem:[%s4074_s18 + $0x18] sm:$0x1] }
 0x360   : > { %2975 = vmatpush3.xpose.msk.msra.mxu1 %vm832_vm5, %v1652_v22  ;;  %2924 = vmatprep.mubr.msk.f32.mxu1 %vm3318_vm4, %v4592_v36 }
 0x361   : > { %2976 = vmatprep.subr.mxu1 %v4592_v36 }
 0x363   : > { %v2041_v48 = vpop.permute.xlu1 %2040  ;;  %2925 = vmatmul.mubr.msk.f32.gmra.mxu1 %vm832_vm5, %v1228_v12  ;;  %v1640_v49 = vpop.permute.xlu0 %1639  ;;  %v2708_v12 = vld [vmem:[%s4074_s18 + $0x10] sm:$0xff]  }
 0x364   : > { %2977 = vmatpush3.xpose.msk.msra.mxu1 %vm832_vm5, %v1650_v24  ;;  %2927 = vmatprep.mubr.msk.f32.mxu1 %vm3318_vm4, %v4592_v36 }
 0x365   : > { %2978 = vmatprep.subr.mxu1 %v4592_v36 }
 0x367   : > { %v2039_v50 = vpop.permute.xlu1 %2038  ;;  %2928 = vmatmul.mubr.msk.f32.gmra.mxu1 %vm832_vm5, %v1230_v35  ;;  %v1642_v54 = vpop.permute.xlu0 %1641 }
 0x368   : > { %2979 = vmatpush3.xpose.msk.msra.mxu1 %vm832_vm5, %v1648_v26  ;;  %2930 = vmatprep.mubr.msk.f32.mxu1 %vm3318_vm4, %v4592_v36 }
 0x369   : > { %2980 = vmatprep.subr.mxu1 %v4592_v36 }
 0x36b   : > { %v2027_v11 = vpop.permute.xlu1 %2026  ;;  %2931 = vmatmul.mubr.msk.f32.gmra.mxu1 %vm832_vm5, %v1232_v37  ;;  %v1644_v25 = vpop.permute.xlu0 %1643 }
 0x36c   : > { %2981 = vmatpush3.xpose.msk.msra.mxu1 %vm832_vm5, %v1646_v30  ;;  %2982 = vmatprep.mubr.msk.f32.mxu1 %vm3318_vm4, %v4592_v36 }
 0x36d   : > { %3038 = vmatprep.subr.mxu1 %v4592_v36 }
 0x36f   : > { %v3999_v55 = vpop.permute.xlu1 %2030  ;;  %2983 = vmatmul.mubr.msk.f32.vlgmr.msra.gmra.mxu1 %vm832_vm5, %v1632_v39  ;;  %v2025_v56 = vpop.permute.xlu0 %2024 }
 0x370   : > { %3039 = vmatpush3.xpose.msk.msra.mxu1 %vm832_vm5, %v2051_v34  ;;  %2985 = vmatprep.mubr.msk.f32.mxu1 %vm3318_vm4, %v4592_v36 }
 0x371   : > { %3040 = vmatprep.subr.mxu1 %v4592_v36 }
 0x373   : > { %v2035_v57 = vpop.permute.xlu1 %2034  ;;  %2986 = vmatmul.mubr.msk.f32.gmra.mxu1 %vm832_vm5, %v1634_v0  ;;  %v2029_v61 = vpop.permute.xlu0 %2028 }
 0x374   : > { %3041 = vmatpush3.xpose.msk.msra.mxu1 %vm832_vm5, %v2049_v52  ;;  %2988 = vmatprep.mubr.msk.f32.mxu1 %vm3318_vm4, %v4592_v36  ;;  %v2677_v52 = vunpack.c.l.bf16 %v2708_v12 }
 0x375   : > { %3042 = vmatprep.subr.mxu1 %v4592_v36 }
 0x377   : > { %v1077_v58 = vpop.permute.xlu1 %1076  ;;  %2989 = vmatmul.mubr.msk.f32.gmra.mxu1 %vm832_vm5, %v1636_v16  ;;  %v2033_v59 = vpop.permute.xlu0 %2032 }
 0x378   : > { %3043 = vmatpush3.xpose.msk.msra.mxu1 %vm832_vm5, %v2047_v38  ;;  %2991 = vmatprep.mubr.msk.f32.mxu1 %vm3318_vm4, %v4592_v36 }
 0x379   : > { %3044 = vmatprep.subr.mxu1 %v4592_v36 }
 0x37b   : > { %v1071_v60 = vpop.permute.xlu1 %1070  ;;  %2992 = vmatmul.mubr.msk.f32.gmra.mxu1 %vm832_vm5, %v1638_v47  ;;  %v2037_v1 = vpop.permute.xlu0 %2036 }
 0x37c   : > { %3045 = vmatpush3.xpose.msk.msra.mxu1 %vm832_vm5, %v2045_v46  ;;  %2994 = vmatprep.mubr.msk.f32.mxu1 %vm3318_vm4, %v4592_v36 }
 0x37d   : > { %3046 = vmatprep.subr.mxu1 %v4592_v36 }
 0x37f   : > { %v4021_v2 = vpop.permute.xlu1 %1489  ;;  %2995 = vmatmul.mubr.msk.f32.gmra.mxu1 %vm832_vm5, %v1640_v49  ;;  %v1079_v29 = vpop.permute.xlu0 %1078 }
 0x380   : > { %3047 = vmatpush3.xpose.msk.msra.mxu1 %vm832_vm5, %v2043_v42  ;;  %2997 = vmatprep.mubr.msk.f32.mxu1 %vm3318_vm4, %v4592_v36  ;;  %v2678_v42 = vunpack.c.h.bf16 %v2708_v12 }
 0x381   : > { %3048 = vmatprep.subr.mxu1 %v4592_v36 }
 0x383   : > { %v4028_v3 = vpop.permute.xlu1 %1483  ;;  %2998 = vmatmul.mubr.msk.f32.gmra.mxu1 %vm832_vm5, %v1642_v54  ;;  %v1075_v4 = vpop.permute.xlu0 %1074 }
 0x384   : > { %3049 = vmatpush3.xpose.msk.msra.mxu1 %vm832_vm5, %v2041_v48  ;;  %3000 = vmatprep.mubr.msk.f32.mxu1 %vm3318_vm4, %v4592_v36 }
 0x385   : > { %3050 = vmatprep.subr.mxu1 %v4592_v36 }
 0x387   : > { %v1081_v5 = vpop.permute.xlu1 %1080  ;;  %3001 = vmatmul.mubr.msk.f32.gmra.mxu1 %vm832_vm5, %v1644_v25  ;;  %v1073_v17 = vpop.permute.xlu0 %1072 }
 0x388   : > { %2864 = vmatpush3.msk.msra.mxu0 %vm1109_vm6, %v1081_v5  ;;  %3051 = vmatpush3.xpose.msk.msra.mxu1 %vm832_vm5, %v2039_v50 }
 0x389   : > { %2865 = vmatprep.subr.mxu0 %v4592_v36  ;;  %3052 = vmatprep.mubr.msk.f32.mxu1 %vm3318_vm4, %v4592_v36 }
 0x38a   : > { %2866 = vmatpush3.msra.mxu0 %v1079_v29  ;;  %3108 = vmatprep.subr.mxu1 %v4592_v36 }
 0x38b   : > { %2867 = vmatprep.subr.mxu0 %v4592_v36  ;;  %3053 = vmatmul.mubr.msk.f32.vlgmr.msra.gmra.mxu1 %vm832_vm5, %v2025_v56  ;;  %v1069_v8 = vpop.permute.xlu0 %1068 }
 0x38c   : > { %2868 = vmatpush3.msra.mxu0 %v1077_v58  ;;  %3055 = vmatprep.mubr.msk.f32.mxu1 %vm3318_vm4, %v4592_v36  ;;  %v804_v58 = vpop.f32.mrf.mxu0 }
 0x38d   : > { %2869 = vmatprep.subr.mxu0 %v4592_v36 }
 0x38e   : > { %2870 = vmatpush3.msra.mxu0 %v1075_v4 }
 0x38f   : > { %2871 = vmatprep.subr.mxu0 %v4592_v36  ;;  %3056 = vmatmul.mubr.msk.f32.gmra.mxu1 %vm832_vm5, %v2027_v11 }
 0x390   : > { %2872 = vmatpush3.msra.mxu0 %v1073_v17  ;;  %3058 = vmatprep.mubr.msk.f32.mxu1 %vm3318_vm4, %v4592_v36 }
 0x391   : > { %2873 = vmatprep.subr.mxu0 %v4592_v36 }
 0x392   : > { %2874 = vmatpush3.msra.mxu0 %v1071_v60 }
 0x393   : > { %2875 = vmatprep.subr.mxu0 %v4592_v36  ;;  %3059 = vmatmul.mubr.msk.f32.gmra.mxu1 %vm832_vm5, %v2029_v61 }
 0x394   : > { %2876 = vmatpush3.msra.mxu0 %v1069_v8  ;;  %3061 = vmatprep.mubr.msk.f32.mxu1 %vm3318_vm4, %v4592_v36 }
 0x395   : > { %2933 = vmatprep.subr.mxu0 %v4592_v36 }
 0x397   : > { %3062 = vmatmul.mubr.msk.f32.gmra.mxu1 %vm832_vm5, %v3999_v55 }
 0x398   : > { %3064 = vmatprep.mubr.msk.f32.mxu1 %vm3318_vm4, %v4592_v36 }
 0x39b   : > { %3065 = vmatmul.mubr.msk.f32.gmra.mxu1 %vm832_vm5, %v2033_v59 }
 0x39c   : > { %3067 = vmatprep.mubr.msk.f32.mxu1 %vm3318_vm4, %v4592_v36 }
 0x39f   : > { %3068 = vmatmul.mubr.msk.f32.gmra.mxu1 %vm832_vm5, %v2035_v57 }
 0x3a0   : > { %3070 = vmatprep.mubr.msk.f32.mxu1 %vm3318_vm4, %v4592_v36 }
 0x3a3   : > { %3071 = vmatmul.mubr.msk.f32.gmra.mxu1 %vm832_vm5, %v2037_v1  ;;  %v4104_v1 = vadd.f32 %v804_v58, %v3788_v40  ;;  %v2711_v58 = vld [vmem:[%s4074_s18 + $0x38] sm:$0xff]  }
 0x3a4   : > { %3099 = vmatprep.mubr.msk.f32.mxu1 %vm3318_vm4, %v4592_v36 }
 0x3f7   : > { %v927_v7 = vpop.f32.mrf.mxu1 }
 0x3f8   : > { %v961_v62 = vmul.f32 0.35355338, %v927_v7 }
 0x3f9   : > { %v2844_v28 = vpop.f32.mrf.mxu1 }
 0x3fa   : > { %v4077_v41 = vadd.f32 %v2669_v6, %v961_v62 }
 0x3fb   : > { %v932_v21 = vpop.f32.mrf.mxu1 }
 0x3fc   : > { %v962_v14 = vmul.f32 0.35355338, %v932_v21  ;;  %v990_v44 = vsel %vm989_vm7, %v4077_v41, -inf }
 0x3fd   : > { %991 = vmax.xlane.f32.xlu1 %v990_v44  ;;  %v2847_v15 = vpop.f32.mrf.mxu1 }
 0x3fe   : > { %v4082_v18 = vadd.f32 %v2670_v32, %v962_v14  ;;  %v981_v15 = vunpack.c.l.bf16 %v974_v9 }
 0x3ff   : > { %v937_v19 = vpop.f32.mrf.mxu1 }
 0x400   : > { %v963_v51 = vmul.f32 0.35355338, %v937_v19  ;;  %v993_v22 = vsel %vm989_vm7, %v4082_v18, -inf }
 0x401   : > { %994 = vmax.xlane.f32.xlu0 %v993_v22  ;;  %v2850_v33 = vpop.f32.mrf.mxu1 }
 0x402   : > { %v4086_v24 = vadd.f32 %v2673_v31, %v963_v51  ;;  %v2592_v31 = vld [vmem:[%s4074_s18 + $0x1c] ss:$20 sps:$4 sm:$0xff]   ;;  %v2709_v51 = vld [vmem:[%s4074_s18 + $0x20] sm:$0xff]  }
 0x403   : > { %v942_v26 = vpop.f32.mrf.mxu1  ;;  %v1390_v33 = vunpack.c.l.bf16 %v2592_v31  ;;  %v2681_v12 = vunpack.c.l.bf16 %v2709_v51 }
 0x404   : > { %v964_v30 = vmul.f32 0.35355338, %v942_v26  ;;  %v996_v35 = vsel %vm989_vm7, %v4086_v24, -inf }
 0x405   : > { %997 = vmax.xlane.f32.xlu0 %v996_v35  ;;  %v2853_v34 = vpop.f32.mrf.mxu1 }
 0x406   : > { %v4091_v37 = vadd.f32 %v2674_v23, %v964_v30  ;;  %v2710_v30 = vld [vmem:[%s4074_s18 + $0x28] sm:$0xff]  }
 0x407   : > { %v947_v39 = vpop.f32.mrf.mxu1 }
 0x408   : > { %v965_v38 = vmul.f32 0.35355338, %v947_v39  ;;  %v999_v0 = vsel %vm989_vm7, %v4091_v37, -inf  ;;  %v2682_v39 = vunpack.c.h.bf16 %v2709_v51 }
 0x409   : > { %1000 = vmax.xlane.f32.xlu0 %v999_v0  ;;  %v2856_v46 = vpop.f32.mrf.mxu1 }
 0x40a   : > { %v4095_v16 = vadd.f32 %v2677_v52, %v965_v38  ;;  %v2685_v38 = vunpack.c.l.bf16 %v2710_v30 }
 0x40b   : > { %v952_v47 = vpop.f32.mrf.mxu1 }
 0x40c   : > { %v966_v48 = vmul.f32 0.35355338, %v952_v47  ;;  %v1002_v49 = vsel %vm989_vm7, %v4095_v16, -inf }
 0x40d   : > { %1003 = vmax.xlane.f32.xlu1 %v1002_v49  ;;  %v2859_v50 = vpop.f32.mrf.mxu1 }
 0x40e   : > { %v4099_v54 = vadd.f32 %v2678_v42, %v966_v48 }
 0x40f   : > { %v957_v11 = vpop.f32.mrf.mxu1 }
 0x410   : > { %v1005_v25 = vsel %vm989_vm7, %v4099_v54, -inf  ;;  %v967_v44 = vmul.f32 0.35355338, %v957_v11 }
 0x411   : > { %1006 = vmax.xlane.f32.xlu0 %v1005_v25  ;;  %v2862_v55 = vpop.f32.mrf.mxu1  ;;  %v2686_v25 = vunpack.c.h.bf16 %v2710_v30 }
 0x412   : > { %v4113_v23 = vadd.f32 %v981_v15, %v967_v44  ;;  %v1395_v55 = vunpack.c.h.bf16 %v2592_v31 }
 0x413   : > { %v1341_v56 = vpop.f32.mrf.mxu1 }
 0x414   : > { %v1009_v48 = vsel %vm1008_vm8, %v4113_v23, -inf }
 0x415   : > { %v2914_v57 = vpop.f32.mrf.mxu1 }
 0x417   : > { %v1346_v61 = vpop.f32.mrf.mxu1 }
 0x418   : > { %v1376_v26 = vmul.f32 0.35355338, %v1346_v61 }
 0x419   : > { %v2917_v59 = vpop.f32.mrf.mxu1 }
 0x41a   : > { %v4118_v46 = vadd.f32 %v2681_v12, %v1376_v26 }
 0x41b   : > { %v1351_v60 = vpop.f32.mrf.mxu1 }
 0x41c   : > { %v1377_v52 = vmul.f32 0.35355338, %v1351_v60 }
 0x41d   : > { %v2920_v29 = vpop.f32.mrf.mxu1 }
 0x41e   : > { %2304 = vrot.lane.b32.xlu1 %v4104_v1, %s3316_s5  ;;  %v4122_v50 = vadd.f32 %v2682_v39, %v1377_v52  ;;  %v1407_v29 = vsel %vm989_vm7, %v4118_v46, -inf }
 0x41f   : > { %v1356_v4 = vpop.f32.mrf.mxu1 }
 0x420   : > { %v1378_v42 = vmul.f32 0.35355338, %v1356_v4 }
 0x421   : > { %v2923_v5 = vpop.f32.mrf.mxu1 }
 0x422   : > { %v4125_v57 = vadd.f32 %v2685_v38, %v1378_v42 }
 0x423   : > { %v1361_v17 = vpop.f32.mrf.mxu1 }
 0x424   : > { %v1379_v11 = vmul.f32 0.35355338, %v1361_v17  ;;  %v1413_v44 = vsel %vm989_vm7, %v4125_v57, -inf }
 0x425   : > { %v2926_v8 = vpop.f32.mrf.mxu1 }
 0x426   : > { %v4132_v5 = vadd.f32 %v2686_v25, %v1379_v11  ;;  %v2689_v8 = vunpack.c.l.bf16 %v2711_v58 }
 0x427   : > { %1481 = vrot.lane.b32.xlu0 %v3833_v53, %s3313_s14  ;;  %v1366_v27 = vpop.f32.mrf.mxu1  ;;  %v1375_v53 = vmul.f32 0.35355338, %v1341_v56  ;;  %v2598_v56 = vld [vmem:[%s4074_s18 + $0x34] sm:$0x1] }
 0x428   : > { %v1380_v61 = vmul.f32 0.35355338, %v1366_v27  ;;  %v1396_v17 = vunpack.c.l.bf16 %v2598_v56 }
 0x429   : > { %v2929_v6 = vpop.f32.mrf.mxu1  ;;  %v4116_v0 = vadd.f32 %v1390_v33, %v1375_v53  ;;  %v1416_v33 = vsel %vm989_vm7, %v4132_v5, -inf }
 0x42a   : > { %v1410_v6 = vsel %vm989_vm7, %v4122_v50, -inf }
 0x42b   : > { %v1371_v7 = vpop.f32.mrf.mxu1  ;;  %v1404_v60 = vsel %vm989_vm7, %v4116_v0, -inf }
 0x42c   : > { %v1381_v27 = vmul.f32 0.35355338, %v1371_v7 }
 0x42d   : > { %v2932_v62 = vpop.f32.mrf.mxu1 }
 0x42e   : > { %v4136_v62 = vadd.f32 %v1395_v55, %v1380_v61  ;;  %v4143_v53 = vadd.f32 %v1396_v17, %v1381_v27  ;;  %v2714_v17 = vld [vmem:[%s4074_s18 + $0x58] sm:$0xff]  }
 0x42f   : > { %v1753_v40 = vpop.f32.mrf.mxu1 }
 0x430   : > { %v1419_v30 = vsel %vm989_vm7, %v4136_v62, -inf  ;;  %v1422_v11 = vsel %vm1008_vm8, %v4143_v53, -inf }
 0x431   : > { %v2984_v28 = vpop.f32.mrf.mxu1 }
 0x432   : > { %v1787_v28 = vmul.f32 0.35355338, %v1753_v40  ;;  %v2713_v40 = vld [vmem:[%s4074_s18 + $0x48] sm:$0xff]  }
 0x433   : > { %v1758_v32 = vpop.f32.mrf.mxu1  ;;  %v2697_v38 = vunpack.c.l.bf16 %v2713_v40 }
 0x434   : > { %v1788_v31 = vmul.f32 0.35355338, %v1758_v32  ;;  %v4145_v26 = vadd.f32 %v2689_v8, %v1787_v28 }
 0x435   : > { %v2987_v21 = vpop.f32.mrf.mxu1 }
 0x436   : > { %v2712_v21 = vld [vmem:[%s4074_s18 + $0x40] sm:$0xff]   ;;  %v1816_v25 = vsel %vm989_vm7, %v4145_v26, -inf }
 0x437   : > { %v1763_v14 = vpop.f32.mrf.mxu1  ;;  %v2693_v51 = vunpack.c.l.bf16 %v2712_v21  ;;  %v2694_v39 = vunpack.c.h.bf16 %v2712_v21 }
 0x438   : > { %v1789_v7 = vmul.f32 0.35355338, %v1763_v14 }
 0x439   : > { %v2990_v19 = vpop.f32.mrf.mxu1 }
 0x43a   : > { %v2690_v19 = vunpack.c.h.bf16 %v2711_v58  ;;  %v4152_v42 = vadd.f32 %v2693_v51, %v1789_v7  ;;  %v2650_v58 = vld [vmem:[%s4074_s18 + $0x54] ss:$20 sps:$4 sm:$0xff]  }
 0x43b   : > { %v1768_v22 = vpop.f32.mrf.mxu1  ;;  %v2195_v21 = vunpack.c.l.bf16 %v2650_v58 }
 0x43c   : > { %v4150_v32 = vadd.f32 %v2690_v19, %v1788_v31  ;;  %v1790_v52 = vmul.f32 0.35355338, %v1768_v22  ;;  %v2698_v22 = vunpack.c.h.bf16 %v2713_v40 }
 0x43d   : > { %v2993_v35 = vpop.f32.mrf.mxu1 }
 0x43e   : > { %v4159_v56 = vadd.f32 %v2694_v39, %v1790_v52 }
 0x43f   : > { %v1773_v34 = vpop.f32.mrf.mxu1 }
 0x441   : > { %v2996_v47 = vpop.f32.mrf.mxu1 }
 0x442   : > { %1010 = vmax.xlane.f32.xlu1 %v1009_v48  ;;  %v1791_v47 = vmul.f32 0.35355338, %v1773_v34  ;;  %v2627_v48 = vld [vmem:[%s4074_s18 + $0x50] sm:$0x1]  ;;  %v1819_v34 = vsel %vm989_vm7, %v4150_v32, -inf }
 0x443   : > { %v1778_v49 = vpop.f32.mrf.mxu1  ;;  %v1808_v61 = vunpack.c.l.bf16 %v2627_v48 }
 0x445   : > { %v2999_v59 = vpop.f32.mrf.mxu1 }
 0x446   : > { %1405 = vmax.xlane.f32.xlu0 %v1404_v60  ;;  %1408 = vmax.xlane.f32.xlu1 %v1407_v29  ;;  %v4164_v59 = vadd.f32 %v2697_v38, %v1791_v47  ;;  %v1792_v60 = vmul.f32 0.35355338, %v1778_v49 }
 0x447   : > { %v1783_v4 = vpop.f32.mrf.mxu1 }
 0x448   : > { %v1793_v29 = vmul.f32 0.35355338, %v1783_v4  ;;  %v4171_v31 = vadd.f32 %v2698_v22, %v1792_v60  ;;  %v2715_v4 = vld [vmem:[%s4074_s18 + $0x60] sm:$0xff]   ;;  %v2656_v22 = vld [vmem:[%s4074_s18 + $0x6c] sm:$0x1] }
 0x449   : > { %v3002_v9 = vpop.f32.mrf.mxu1 }
 0x44a   : > { %1411 = vmax.xlane.f32.xlu0 %v1410_v6  ;;  %1414 = vmax.xlane.f32.xlu1 %v1413_v44  ;;  %v1822_v6 = vsel %vm989_vm7, %v4152_v42, -inf  ;;  %v2701_v9 = vunpack.c.l.bf16 %v2714_v17  ;;  %v1825_v44 = vsel %vm989_vm7, %v4159_v56, -inf  ;;  %v4173_v19 = vadd.f32 %v1808_v61, %v1793_v29 }
 0x44b   : > { %v2146_v15 = vpop.f32.mrf.mxu1 }
 0x44c   : > { %v2180_v28 = vmul.f32 0.35355338, %v2146_v15  ;;  %v1834_v47 = vsel %vm1008_vm8, %v4173_v19, -inf }
 0x44d   : > { %v3054_v12 = vpop.f32.mrf.mxu1 }
 0x44e   : > { %1417 = vmax.xlane.f32.xlu0 %v1416_v33  ;;  %1420 = vmax.xlane.f32.xlu1 %v1419_v30  ;;  %v1828_v33 = vsel %vm989_vm7, %v4164_v59, -inf  ;;  %v4178_v40 = vadd.f32 %v2195_v21, %v2180_v28  ;;  %v2702_v12 = vunpack.c.h.bf16 %v2714_v17  ;;  %v2705_v30 = vunpack.c.l.bf16 %v2715_v4 }
 0x44f   : > { %v2151_v35 = vpop.f32.mrf.mxu1 }
 0x450   : > { %v2181_v49 = vmul.f32 0.35355338, %v2151_v35  ;;  %v1831_v35 = vsel %vm989_vm7, %v4171_v31, -inf }
 0x451   : > { %v3057_v14 = vpop.f32.mrf.mxu1 }
 0x452   : > { %1423 = vmax.xlane.f32.xlu0 %v1422_v11  ;;  %1817 = vmax.xlane.f32.xlu1 %v1816_v25  ;;  %v4180_v52 = vadd.f32 %v2701_v9, %v2181_v49  ;;  %v2706_v11 = vunpack.c.h.bf16 %v2715_v4  ;;  %v2200_v25 = vunpack.c.h.bf16 %v2650_v58 }
 0x453   : > { %v2156_v55 = vpop.f32.mrf.mxu1 }
 0x454   : > { %v2182_v15 = vmul.f32 0.35355338, %v2156_v55  ;;  %v2209_v55 = vsel %vm989_vm7, %v4178_v40, -inf  ;;  %v2212_v17 = vsel %vm989_vm7, %v4180_v52, -inf }
 0x455   : > { %v3060_v8 = vpop.f32.mrf.mxu1 }
 0x456   : > { %1820 = vmax.xlane.f32.xlu0 %v1819_v34  ;;  %1823 = vmax.xlane.f32.xlu1 %v1822_v6  ;;  %v4186_v14 = vadd.f32 %v2702_v12, %v2182_v15  ;;  %v2201_v6 = vunpack.c.l.bf16 %v2656_v22  ;;  %v4215_v12 = vpop.permute.xlu1 %1493 }
 0x457   : > { %v2161_v27 = vpop.f32.mrf.mxu1 }
 0x458   : > { %v2183_v39 = vmul.f32 0.35355338, %v2161_v27  ;;  %v2215_v27 = vsel %vm989_vm7, %v4186_v14, -inf }
 0x459   : > { %v3063_v51 = vpop.f32.mrf.mxu1 }
 0x45a   : > { %1826 = vmax.xlane.f32.xlu0 %v1825_v44  ;;  %1829 = vmax.xlane.f32.xlu1 %v1828_v33  ;;  %v4191_v61 = vadd.f32 %v2705_v30, %v2183_v39 }
 0x45b   : > { %v2166_v7 = vpop.f32.mrf.mxu1 }
 0x45c   : > { %v2184_v34 = vmul.f32 0.35355338, %v2166_v7  ;;  %v2218_v44 = vsel %vm989_vm7, %v4191_v61, -inf  ;;  %v4211_v7 = vpop.permute.xlu0 %1491 }
 0x45d   : > { %v3066_v38 = vpop.f32.mrf.mxu1 }
 0x45e   : > { %1832 = vmax.xlane.f32.xlu0 %v1831_v35  ;;  %1835 = vmax.xlane.f32.xlu1 %v1834_v47  ;;  %v4197_v58 = vadd.f32 %v2706_v11, %v2184_v34 }
 0x45f   : > { %v2171_v48 = vpop.f32.mrf.mxu1 }
 0x460   : > { %v2185_v60 = vmul.f32 0.35355338, %v2171_v48  ;;  %v2221_v4 = vsel %vm989_vm7, %v4197_v58, -inf  ;;  %v4213_v15 = vpop.permute.xlu0 %1487 }
 0x461   : > { %v3069_v29 = vpop.f32.mrf.mxu1 }
 0x462   : > { %2210 = vmax.xlane.f32.xlu0 %v2209_v55  ;;  %2213 = vmax.xlane.f32.xlu1 %v2212_v17  ;;  %v4199_v28 = vadd.f32 %v2200_v25, %v2185_v60 }
 0x463   : > { %v2176_v8 = vpop.f32.mrf.mxu1 }
 0x464   : > { %v2186_v21 = vmul.f32 0.35355338, %v2176_v8  ;;  %v2224_v51 = vsel %vm989_vm7, %v4199_v28, -inf  ;;  %v4217_v30 = vpop.permute.xlu0 %1485 }
 0x465   : > { %v3072_v9 = vpop.f32.mrf.mxu1 }
 0x466   : > { %2216 = vmax.xlane.f32.xlu0 %v2215_v27  ;;  %2219 = vmax.xlane.f32.xlu1 %v2218_v44  ;;  %v4203_v49 = vadd.f32 %v2201_v6, %v2186_v21 }
 0x468   : > { %v2227_v33 = vsel %vm1008_vm8, %v4203_v49, -inf }
 0x46a   : > { %2222 = vmax.xlane.f32.xlu0 %v2221_v4  ;;  %2225 = vmax.xlane.f32.xlu1 %v2224_v51 }
 0x46e   : > { %2228 = vmax.xlane.f32.xlu0 %v2227_v33 }
 0x486   : > { %v992_v39 = vpop.xlane.xlu1 %991 }
 0x487   : > { %v1012_v38 = vsub.f32 %v4077_v41, %v992_v39 }
 0x489   : > { %v1019_v35 = vmul.f32 1.442695, %v1012_v38 }
 0x48a   : > { %v995_v47 = vpop.xlane.xlu0 %994 }
 0x48b   : > { %3186 = vpow2.f32 %v1019_v35  ;;  %v1013_v48 = vsub.f32 %v4082_v18, %v995_v47 }
 0x48d   : > { %v1021_v11 = vmul.f32 1.442695, %v1013_v48 }
 0x48e   : > { %v998_v25 = vpop.xlane.xlu0 %997 }
 0x48f   : > { %3188 = vpow2.f32 %v1021_v11  ;;  %v1014_v55 = vsub.f32 %v4086_v24, %v998_v25 }
 0x491   : > { %v1023_v22 = vmul.f32 1.442695, %v1014_v55 }
 0x492   : > { %v1001_v34 = vpop.xlane.xlu0 %1000 }
 0x493   : > { %3190 = vpow2.f32 %v1023_v22  ;;  %v1015_v60 = vsub.f32 %v4091_v37, %v1001_v34 }
 0x495   : > { %v1025_v29 = vmul.f32 1.442695, %v1015_v60 }
 0x496   : > { %v1004_v17 = vpop.xlane.xlu1 %1003 }
 0x497   : > { %3192 = vpow2.f32 %v1025_v29  ;;  %v1016_v41 = vsub.f32 %v4095_v16, %v1004_v17 }
 0x498   : > { %v4224_v8 = vpop.eup %3186 }
 0x499   : > { %v1027_v6 = vmul.f32 1.442695, %v1016_v41  ;;  %v1033_v18 = vsel %vm989_vm7, %v4224_v8, 0.0 }
 0x49a   : > { %v4228_v27 = vpop.permute.xlu1 %2304  ;;  %1034 = vadd.xlane.f32.xlu1 %v1033_v18  ;;  %v1007_v24 = vpop.xlane.xlu0 %1006 }
 0x49b   : > { %3194 = vpow2.f32 %v1027_v6  ;;  %v1017_v21 = vsub.f32 %v4099_v54, %v1007_v24  ;;  %3115 = vmatpush3.msk.msra.mxu1 %vm1109_vm6, %v4228_v27 }
 0x49c   : > { %v4233_v37 = vpop.eup %3188  ;;  %3109 = vmatprep.subr.mxu1 %v4592_v36 }
 0x49d   : > { %v1029_v16 = vmul.f32 1.442695, %v1017_v21  ;;  %v1036_v9 = vsel %vm989_vm7, %v4233_v37, 0.0 }
 0x49e   : > { %1037 = vadd.xlane.f32.xlu0 %v1036_v9  ;;  %v4254_v47 = vpop.permute.xlu0 %1481 }
 0x49f   : > { %3196 = vpow2.f32 %v1029_v16 }
 0x4a0   : > { %v4238_v44 = vpop.eup %3190 }
 0x4a1   : > { %v1039_v4 = vsel %vm989_vm7, %v4238_v44, 0.0 }
 0x4a2   : > { %1040 = vadd.xlane.f32.xlu1 %v1039_v4 }
 0x4a4   : > { %v4242_v54 = vpop.eup %3192 }
 0x4a5   : > { %v1042_v51 = vsel %vm989_vm7, %v4242_v54, 0.0 }
 0x4a6   : > { %1043 = vadd.xlane.f32.xlu0 %v1042_v51 }
 0x4a8   : > { %v4246_v33 = vpop.eup %3194 }
 0x4a9   : > { %v1045_v39 = vsel %vm989_vm7, %v4246_v33, 0.0 }
 0x4aa   : > { %1046 = vadd.xlane.f32.xlu0 %v1045_v39 }
 0x4ac   : > { %v4250_v38 = vpop.eup %3196 }
 0x4ad   : > { %v1048_v35 = vsel %vm989_vm7, %v4250_v38, 0.0 }
 0x4ae   : > { %1049 = vadd.xlane.f32.xlu1 %v1048_v35 }
 0x4cb   : > { %v1011_v48 = vpop.xlane.xlu1 %1010 }
 0x4cc   : > { %v1018_v11 = vsub.f32 %v4113_v23, %v1011_v48 }
 0x4ce   : > { %v1031_v25 = vmul.f32 1.442695, %v1018_v11 }
 0x4cf   : > { %v1409_v55 = vpop.xlane.xlu1 %1408  ;;  %v1406_v22 = vpop.xlane.xlu0 %1405 }
 0x4d0   : > { %3198 = vpow2.f32 %v1031_v25  ;;  %v1426_v34 = vsub.f32 %v4118_v46, %v1409_v55  ;;  %v1425_v60 = vsub.f32 %v4116_v0, %v1406_v22 }
 0x4d2   : > { %v1434_v29 = vmul.f32 1.442695, %v1426_v34  ;;  %v1432_v17 = vmul.f32 1.442695, %v1425_v60 }
 0x4d3   : > { %v1415_v41 = vpop.xlane.xlu1 %1414  ;;  %v1412_v6 = vpop.xlane.xlu0 %1411 }
 0x4d4   : > { %3200 = vpow2.f32 %v1434_v29  ;;  %v1428_v18 = vsub.f32 %v4125_v57, %v1415_v41  ;;  %v1427_v24 = vsub.f32 %v4122_v50, %v1412_v6 }
 0x4d5   : > { %3202 = vpow2.f32 %v1432_v17 }
 0x4d6   : > { %v1436_v21 = vmul.f32 1.442695, %v1427_v24  ;;  %v1438_v23 = vmul.f32 1.442695, %v1428_v18 }
 0x4d7   : > { %v1421_v16 = vpop.xlane.xlu1 %1420  ;;  %v1418_v9 = vpop.xlane.xlu0 %1417 }
 0x4d8   : > { %v1430_v4 = vsub.f32 %v4136_v62, %v1421_v16  ;;  %v1429_v46 = vsub.f32 %v4132_v5, %v1418_v9  ;;  %3204 = vpow2.f32 %v1436_v21 }
 0x4d9   : > { %3206 = vpow2.f32 %v1438_v23 }
 0x4da   : > { %v1440_v0 = vmul.f32 1.442695, %v1429_v46  ;;  %v1442_v51 = vmul.f32 1.442695, %v1430_v4 }
 0x4db   : > { %v1424_v39 = vpop.xlane.xlu0 %1423  ;;  %v1818_v24 = vpop.xlane.xlu1 %1817 }
 0x4dc   : > { %v1431_v35 = vsub.f32 %v4143_v53, %v1424_v39  ;;  %3208 = vpow2.f32 %v1440_v0 }
 0x4dd   : > { %v4264_v48 = vpop.eup %3198  ;;  %3210 = vpow2.f32 %v1442_v51 }
 0x4de   : > { %v1444_v50 = vmul.f32 1.442695, %v1431_v35  ;;  %v1051_v57 = vsel %vm1008_vm8, %v4264_v48, 0.0 }
 0x4df   : > { %1052 = vadd.xlane.f32.xlu0 %v1051_v57  ;;  %v1821_v21 = vpop.xlane.xlu0 %1820  ;;  %v1824_v23 = vpop.xlane.xlu1 %1823 }
 0x4e0   : > { %3212 = vpow2.f32 %v1444_v50  ;;  %v1838_v51 = vsub.f32 %v4150_v32, %v1821_v21 }
 0x4e1   : > { %v4268_v11 = vpop.eup %3200 }
 0x4e2   : > { %v4270_v5 = vpop.eup %3202  ;;  %v1449_v62 = vsel %vm989_vm7, %v4268_v11, 0.0  ;;  %v1846_v50 = vmul.f32 1.442695, %v1838_v51 }
 0x4e3   : > { %1450 = vadd.xlane.f32.xlu0 %v1449_v62  ;;  %v1446_v53 = vsel %vm989_vm7, %v4270_v5, 0.0  ;;  %v1827_v16 = vpop.xlane.xlu0 %1826  ;;  %v1830_v9 = vpop.xlane.xlu1 %1829  ;;  %v1837_v62 = vsub.f32 %v4145_v26, %v1818_v24 }
 0x4e4   : > { %1447 = vadd.xlane.f32.xlu1 %v1446_v53  ;;  %3214 = vpow2.f32 %v1846_v50 }
 0x4e5   : > { %v4276_v25 = vpop.eup %3204 }
 0x4e6   : > { %v1452_v55 = vsel %vm989_vm7, %v4276_v25, 0.0  ;;  %v4280_v22 = vpop.eup %3206 }
 0x4e7   : > { %v1455_v60 = vsel %vm989_vm7, %v4280_v22, 0.0  ;;  %v1833_v4 = vpop.xlane.xlu0 %1832  ;;  %v1836_v46 = vpop.xlane.xlu1 %1835 }
 0x4e8   : > { %1453 = vadd.xlane.f32.xlu1 %v1452_v55  ;;  %v1842_v57 = vsub.f32 %v4171_v31, %v1833_v4  ;;  %v1840_v31 = vsub.f32 %v4159_v56, %v1827_v16  ;;  %v1841_v4 = vsub.f32 %v4164_v59, %v1830_v9 }
 0x4e9   : > { %v4282_v34 = vpop.eup %3208 }
 0x4ea   : > { %v1458_v29 = vsel %vm989_vm7, %v4282_v34, 0.0  ;;  %v4288_v17 = vpop.eup %3210  ;;  %v1854_v53 = vmul.f32 1.442695, %v1842_v57  ;;  %v1852_v50 = vmul.f32 1.442695, %v1841_v4  ;;  %v1843_v57 = vsub.f32 %v4173_v19, %v1836_v46 }
 0x4eb   : > { %1459 = vadd.xlane.f32.xlu0 %v1458_v29  ;;  %v1461_v6 = vsel %vm989_vm7, %v4288_v17, 0.0  ;;  %v2211_v0 = vpop.xlane.xlu0 %2210  ;;  %v2214_v39 = vpop.xlane.xlu1 %2213 }
 0x4ec   : > { %1456 = vadd.xlane.f32.xlu1 %v1455_v60  ;;  %v2230_v55 = vsub.f32 %v4178_v40, %v2211_v0  ;;  %3216 = vpow2.f32 %v1854_v53  ;;  %v1850_v0 = vmul.f32 1.442695, %v1840_v31  ;;  %v1856_v16 = vmul.f32 1.442695, %v1843_v57 }
 0x4ed   : > { %v4290_v41 = vpop.eup %3212  ;;  %v2231_v9 = vsub.f32 %v4180_v52, %v2214_v39 }
 0x4ee   : > { %v1464_v18 = vsel %vm1008_vm8, %v4290_v41, 0.0  ;;  %v2237_v36 = vmul.f32 1.442695, %v2230_v55 }
 0x4ef   : > { %1465 = vadd.xlane.f32.xlu0 %v1464_v18  ;;  %v2217_v35 = vpop.xlane.xlu0 %2216  ;;  %v4308_v60 = vpop.xlane.xlu1 %2219  ;;  %v1839_v18 = vsub.f32 %v4152_v42, %v1824_v23  ;;  %v2239_v53 = vmul.f32 1.442695, %v2231_v9 }
 0x4f0   : > { %1462 = vadd.xlane.f32.xlu1 %v1461_v6  ;;  %v1844_v6 = vmul.f32 1.442695, %v1837_v62  ;;  %v2232_v55 = vsub.f32 %v4186_v14, %v2217_v35 }
 0x4f1   : > { %v1848_v51 = vmul.f32 1.442695, %v1839_v18  ;;  %v4315_v42 = vpop.eup %3214 }
 0x4f2   : > { %3218 = vpow2.f32 %v1844_v6 }
 0x4f3   : > { %v2223_v29 = vpop.xlane.xlu0 %2222  ;;  %v2226_v21 = vpop.xlane.xlu1 %2225  ;;  %3220 = vpow2.f32 %v2237_v36  ;;  %v1861_v36 = vsel %vm989_vm7, %v4315_v42, 0.0 }
 0x4f4   : > { %v2234_v32 = vsub.f32 %v4197_v58, %v2223_v29  ;;  %v2235_v24 = vsub.f32 %v4199_v28, %v2226_v21  ;;  %3222 = vpow2.f32 %v1848_v51  ;;  %v2241_v21 = vmul.f32 1.442695, %v2232_v55 }
 0x4f6   : > { %v2245_v26 = vmul.f32 1.442695, %v2234_v32  ;;  %v2247_v23 = vmul.f32 1.442695, %v2235_v24  ;;  %v2233_v32 = vsub.f32 %v4191_v61, %v4308_v60 }
 0x4f7   : > { %v2229_v40 = vpop.xlane.xlu0 %2228 }
 0x4f8   : > { %3224 = vpow2.f32 %v2245_v26  ;;  %v2236_v58 = vsub.f32 %v4203_v49, %v2229_v40  ;;  %v2243_v4 = vmul.f32 1.442695, %v2233_v32 }
 0x4f9   : > { %3226 = vpow2.f32 %v1850_v0  ;;  %v4321_v28 = vpop.eup %3216 }
 0x4fa   : > { %v2249_v59 = vmul.f32 1.442695, %v2236_v58  ;;  %v1873_v19 = vsel %vm989_vm7, %v4321_v28, 0.0 }
 0x4ff   : > { %v4324_v49 = vpop.eup %3218 }
 0x500   : > { %v4328_v46 = vpop.eup %3220  ;;  %v1858_v52 = vsel %vm989_vm7, %v4324_v49, 0.0 }
 0x501   : > { %2300 = vrot.lane.b32.xlu1 %v3803_v10, %s3316_s5  ;;  %v4331_v6 = vpop.eup %3222  ;;  %v2251_v39 = vsel %vm989_vm7, %v4328_v46, 0.0 }
 0x502   : > { %v1864_v51 = vsel %vm989_vm7, %v4331_v6, 0.0 }
 0x505   : > { %2298 = vrot.lane.b32.xlu1 %v3800_v63, %s3316_s5  ;;  %2302 = vrot.lane.b32.xlu0 %v3808_v13, %s3316_s5  ;;  %v4337_v18 = vpop.eup %3224 }
 0x506   : > { %v4341_v35 = vpop.eup %3226  ;;  %v2263_v31 = vsel %vm989_vm7, %v4337_v18, 0.0 }
 0x507   : > { %v1867_v0 = vsel %vm989_vm7, %v4341_v35, 0.0 }
 0x509   : > { %2296 = vrot.lane.b32.xlu1 %v3797_v20, %s3316_s5 }
 0x523   : > { %v1035_v56 = vpop.xlane.xlu1 %1034 }
 0x524   : > { %3228 = vrcp.f32 %v1035_v56  ;;  %1862 = vadd.xlane.f32.xlu0 %v1861_v36 }
 0x525   : > { %3230 = vpow2.f32 %v2247_v23 }
 0x526   : > { %3232 = vpow2.f32 %v1852_v50  ;;  %v4594_v50 = vmov 0.0  }
 0x527   : > { %v1038_v62 = vpop.xlane.xlu0 %1037 }
 0x528   : > { %3234 = vrcp.f32 %v1038_v62  ;;  %1874 = vadd.xlane.f32.xlu0 %v1873_v19 }
 0x529   : > { %3236 = vpow2.f32 %v2249_v59 }
 0x52a   : > { %3238 = vpow2.f32 %v1856_v16 }
 0x52b   : > { %v1041_v29 = vpop.xlane.xlu1 %1040 }
 0x52c   : > { %3240 = vrcp.f32 %v1041_v29  ;;  %2252 = vadd.xlane.f32.xlu0 %v2251_v39 }
 0x52d   : > { %1859 = vadd.xlane.f32.xlu1 %v1858_v52  ;;  %3242 = vpow2.f32 %v2239_v53 }
 0x52f   : > { %v1044_v14 = vpop.xlane.xlu0 %1043 }
 0x530   : > { %3244 = vrcp.f32 %v1044_v14  ;;  %2264 = vadd.xlane.f32.xlu0 %v2263_v31 }
 0x531   : > { %v3229_v26 = vpop.eup %3228  ;;  %1865 = vadd.xlane.f32.xlu1 %v1864_v51  ;;  %3246 = vpow2.f32 %v2241_v21 }
 0x532   : > { %v4347_v24 = vpop.eup %3230  ;;  %v1061_v40 = vmul.f32 %v3229_v26, %v4224_v8 }
 0x533   : > { %v1047_v61 = vpop.xlane.xlu0 %1046  ;;  %v4350_v60 = vpop.eup %3232  ;;  %v2266_v58 = vsel %vm989_vm7, %v4347_v24, 0.0 }
 0x534   : > { %3248 = vrcp.f32 %v1047_v61  ;;  %2878 = vmatmul.mubr.msk.f32.vlgmr.msra.gmra.mxu0 %vm989_vm7, %v1061_v40  ;;  %2267 = vadd.xlane.f32.xlu0 %v2266_v58 }
 0x535   : > { %v3235_v23 = vpop.eup %3234  ;;  %2934 = vmatpush3.msk.msra.mxu0 %vm1109_vm6, %v4215_v12  ;;  %1868 = vadd.xlane.f32.xlu1 %v1867_v0  ;;  %3250 = vpow2.f32 %v2243_v4  ;;  %v1870_v12 = vsel %vm989_vm7, %v4350_v60, 0.0 }
 0x536   : > { %v4359_v8 = vpop.eup %3236  ;;  %2935 = vmatprep.subr.mxu0 %v4594_v50  ;;  %v1062_v57 = vmul.f32 %v3235_v23, %v4233_v37  ;;  %2880 = vmatprep.mubr.msk.f32.mxu0 %vm3318_vm4, %v4594_v50 }
 0x537   : > { %2936 = vmatpush3.msra.mxu0 %v4211_v7  ;;  %v1050_v56 = vpop.xlane.xlu1 %1049  ;;  %v4366_v36 = vpop.eup %3238  ;;  %v2269_v7 = vsel %vm1008_vm8, %v4359_v8, 0.0 }
 0x538   : > { %2937 = vmatprep.subr.mxu0 %v4594_v50  ;;  %3252 = vrcp.f32 %v1050_v56  ;;  %2881 = vmatmul.mubr.msk.f32.gmra.mxu0 %vm989_vm7, %v1062_v57 }
 0x539   : > { %v3241_v59 = vpop.eup %3240  ;;  %2938 = vmatpush3.msra.mxu0 %v4021_v2  ;;  %1871 = vadd.xlane.f32.xlu1 %v1870_v12  ;;  %v1876_v2 = vsel %vm1008_vm8, %v4366_v36, 0.0 }
 0x53a   : > { %2270 = vadd.xlane.f32.xlu0 %v2269_v7  ;;  %2939 = vmatprep.subr.mxu0 %v4594_v50  ;;  %v1063_v37 = vmul.f32 %v3241_v59, %v4238_v44  ;;  %v4380_v16 = vpop.eup %3242 }
 0x53b   : > { %2940 = vmatpush3.msra.mxu0 %v4213_v15  ;;  %2883 = vmatprep.mubr.msk.f32.mxu0 %vm3318_vm4, %v4594_v50  ;;  %v2254_v62 = vsel %vm989_vm7, %v4380_v16, 0.0 }
 0x53c   : > { %2941 = vmatprep.subr.mxu0 %v4594_v50  ;;  %2884 = vmatmul.mubr.msk.f32.gmra.mxu0 %vm989_vm7, %v1063_v37 }
 0x53d   : > { %v3245_v9 = vpop.eup %3244  ;;  %2942 = vmatpush3.msra.mxu0 %v4217_v30  ;;  %1877 = vadd.xlane.f32.xlu1 %v1876_v2 }
 0x53e   : > { %2943 = vmatprep.subr.mxu0 %v4594_v50  ;;  %2886 = vmatprep.mubr.msk.f32.mxu0 %vm3318_vm4, %v4594_v50  ;;  %v1064_v15 = vmul.f32 %v3245_v9, %v4242_v54  ;;  %v4392_v44 = vpop.eup %3246 }
 0x53f   : > { %2944 = vmatpush3.msra.mxu0 %v4028_v3  ;;  %v2257_v19 = vsel %vm989_vm7, %v4392_v44, 0.0 }
 0x540   : > { %2945 = vmatprep.subr.mxu0 %v4594_v50  ;;  %2887 = vmatmul.mubr.msk.f32.gmra.mxu0 %vm989_vm7, %v1064_v15 }
 0x541   : > { %v3249_v30 = vpop.eup %3248  ;;  %2946 = vmatpush3.msra.mxu0 %v4254_v47  ;;  %2255 = vadd.xlane.f32.xlu1 %v2254_v62 }
 0x542   : > { %2889 = vmatprep.mubr.msk.f32.mxu0 %vm3318_vm4, %v4594_v50  ;;  %v1065_v54 = vmul.f32 %v3249_v30, %v4246_v33  ;;  %3003 = vmatprep.subr.mxu0 %v4594_v50  ;;  %v4403_v3 = vpop.eup %3250 }
 0x543   : > { %v2260_v55 = vsel %vm989_vm7, %v4403_v3, 0.0 }
 0x544   : > { %2890 = vmatmul.mubr.msk.f32.gmra.mxu0 %vm989_vm7, %v1065_v54 }
 0x545   : > { %v3253_v53 = vpop.eup %3252  ;;  %2258 = vadd.xlane.f32.xlu1 %v2257_v19  ;;  %2892 = vmatprep.mubr.msk.f32.mxu0 %vm3318_vm4, %v4594_v50 }
 0x546   : > { %v1066_v47 = vmul.f32 %v3253_v53, %v4250_v38 }
 0x548   : > { %2893 = vmatmul.mubr.msk.f32.gmra.mxu0 %vm989_vm7, %v1066_v47 }
 0x549   : > { %2261 = vadd.xlane.f32.xlu1 %v2260_v55  ;;  %2895 = vmatprep.mubr.msk.f32.mxu0 %vm3318_vm4, %v4594_v50 }
 0x550   : > { %2294 = vrot.lane.b32.xlu0 %v3794_v45, %s3316_s5 }
 0x55a   : > { %2292 = vrot.lane.b32.xlu1 %v3791_v43, %s3316_s5 }
 0x568   : > { %v1053_v33 = vpop.xlane.xlu0 %1052 }
 0x569   : > { %3254 = vrcp.f32 %v1053_v33 }
 0x56c   : > { %v1451_v38 = vpop.xlane.xlu0 %1450 }
 0x56d   : > { %v1448_v29 = vpop.xlane.xlu1 %1447 }
 0x56e   : > { %3256 = vrcp.f32 %v1448_v29 }
 0x56f   : > { %3258 = vrcp.f32 %v1451_v38 }
 0x571   : > { %v1454_v52 = vpop.xlane.xlu1 %1453 }
 0x572   : > { %3260 = vrcp.f32 %v1454_v52 }
 0x574   : > { %v1460_v32 = vpop.xlane.xlu0 %1459 }
 0x575   : > { %v1457_v39 = vpop.xlane.xlu1 %1456 }
 0x576   : > { %v3255_v21 = vpop.eup %3254  ;;  %3262 = vrcp.f32 %v1457_v39 }
 0x577   : > { %v1067_v14 = vmul.f32 %v3255_v21, %v4264_v48  ;;  %3264 = vrcp.f32 %v1460_v32 }
 0x578   : > { %v1466_v31 = vpop.xlane.xlu0 %1465 }
 0x579   : > { %v1463_v51 = vpop.xlane.xlu1 %1462  ;;  %2896 = vmatmul.mubr.msk.f32.gmra.mxu0 %vm989_vm7, %v1067_v14 }
 0x57a   : > { %2947 = vmatprep.mubr.msk.f32.mxu0 %vm3318_vm4, %v4594_v50  ;;  %3266 = vrcp.f32 %v1463_v51 }
 0x57b   : > { %v3257_v26 = vpop.eup %3256  ;;  %3268 = vrcp.f32 %v1466_v31 }
 0x57c   : > { %v1474_v40 = vmul.f32 %v3257_v26, %v4270_v5  ;;  %v4427_v61 = vpop.permute.xlu0 %2302  ;;  %v3259_v0 = vpop.eup %3258 }
 0x57d   : > { %v4425_v4 = vpop.permute.xlu1 %2300  ;;  %3116 = vmatpush3.msra.mxu1 %v4427_v61  ;;  %v1475_v5 = vmul.f32 %v3259_v0, %v4268_v11 }
 0x57e   : > { %2948 = vmatmul.mubr.msk.f32.vlgmr.msra.gmra.mxu0 %vm989_vm7, %v1474_v40  ;;  %3110 = vmatprep.subr.mxu1 %v4594_v50 }
 0x57f   : > { %3004 = vmatpush3.msk.msra.mxu0 %vm1109_vm6, %v4104_v1  ;;  %3117 = vmatpush3.msra.mxu1 %v4425_v4  ;;  %v3261_v23 = vpop.eup %3260 }
 0x580   : > { %3005 = vmatprep.subr.mxu0 %v4594_v50  ;;  %2950 = vmatprep.mubr.msk.f32.mxu0 %vm3318_vm4, %v4594_v50  ;;  %v1476_v1 = vmul.f32 %v3261_v23, %v4276_v25 }
 0x581   : > { %3006 = vmatpush3.msra.mxu0 %v3808_v13  ;;  %v4437_v48 = vpop.permute.xlu1 %2298  ;;  %3111 = vmatprep.subr.mxu1 %v4594_v50 }
 0x582   : > { %3007 = vmatprep.subr.mxu0 %v4594_v50  ;;  %2951 = vmatmul.mubr.msk.f32.gmra.mxu0 %vm989_vm7, %v1475_v5 }
 0x583   : > { %3118 = vmatpush3.msra.mxu1 %v4437_v48  ;;  %3008 = vmatpush3.msra.mxu0 %v3803_v10  ;;  %v3263_v11 = vpop.eup %3262 }
 0x584   : > { %2953 = vmatprep.mubr.msk.f32.mxu0 %vm3318_vm4, %v4594_v50  ;;  %3009 = vmatprep.subr.mxu0 %v4594_v50  ;;  %v1477_v10 = vmul.f32 %v3263_v11, %v4280_v22  ;;  %v3265_v25 = vpop.eup %3264 }
 0x585   : > { %v4450_v13 = vpop.permute.xlu1 %2296  ;;  %3112 = vmatprep.subr.mxu1 %v4594_v50  ;;  %3010 = vmatpush3.msra.mxu0 %v3800_v63 }
 0x586   : > { %3119 = vmatpush3.msra.mxu1 %v4450_v13  ;;  %3011 = vmatprep.subr.mxu0 %v4594_v50 }
 0x587   : > { %2954 = vmatmul.mubr.msk.f32.gmra.mxu0 %vm989_vm7, %v1476_v1  ;;  %3113 = vmatprep.subr.mxu1 %v4594_v50  ;;  %v3267_v63 = vpop.eup %3266 }
 0x588   : > { %3012 = vmatpush3.msra.mxu0 %v3797_v20  ;;  %2956 = vmatprep.mubr.msk.f32.mxu0 %vm3318_vm4, %v4594_v50  ;;  %v1478_v20 = vmul.f32 %v3265_v25, %v4282_v34  ;;  %v3269_v22 = vpop.eup %3268 }
 0x589   : > { %3013 = vmatprep.subr.mxu0 %v4594_v50 }
 0x58a   : > { %3014 = vmatpush3.msra.mxu0 %v3794_v45  ;;  %v1479_v45 = vmul.f32 %v3267_v63, %v4288_v17 }
 0x58b   : > { %3015 = vmatprep.subr.mxu0 %v4594_v50  ;;  %2957 = vmatmul.mubr.msk.f32.gmra.mxu0 %vm989_vm7, %v1477_v10 }
 0x58c   : > { %3016 = vmatpush3.msra.mxu0 %v3791_v43  ;;  %2959 = vmatprep.mubr.msk.f32.mxu0 %vm3318_vm4, %v4594_v50  ;;  %v1480_v43 = vmul.f32 %v3269_v22, %v4290_v41 }
 0x58d   : > { %3073 = vmatprep.subr.mxu0 %v4594_v50 }
 0x58f   : > { %2960 = vmatmul.mubr.msk.f32.gmra.mxu0 %vm989_vm7, %v1478_v20 }
 0x590   : > { %2962 = vmatprep.mubr.msk.f32.mxu0 %vm3318_vm4, %v4594_v50 }
 0x593   : > { %2963 = vmatmul.mubr.msk.f32.gmra.mxu0 %vm989_vm7, %v1479_v45 }
 0x594   : > { %2965 = vmatprep.mubr.msk.f32.mxu0 %vm3318_vm4, %v4594_v50 }
 0x597   : > { %2966 = vmatmul.mubr.msk.f32.gmra.mxu0 %vm989_vm7, %v1480_v43 }
 0x598   : > { %3017 = vmatprep.mubr.msk.f32.mxu0 %vm3318_vm4, %v4594_v50 }
 0x5ad   : > { %v1863_v34 = vpop.xlane.xlu0 %1862 }
 0x5b1   : > { %v1875_v58 = vpop.xlane.xlu0 %1874 }
 0x5b5   : > { %v2253_v56 = vpop.xlane.xlu0 %2252 }
 0x5b6   : > { %v1860_v57 = vpop.xlane.xlu1 %1859 }
 0x5b7   : > { %3270 = vrcp.f32 %v1860_v57 }
 0x5b8   : > { %3272 = vrcp.f32 %v1863_v34 }
 0x5b9   : > { %v2265_v12 = vpop.xlane.xlu0 %2264 }
 0x5ba   : > { %v1866_v17 = vpop.xlane.xlu1 %1865 }
 0x5bb   : > { %3274 = vrcp.f32 %v1866_v17 }
 0x5bd   : > { %v2268_v7 = vpop.xlane.xlu0 %2267 }
 0x5be   : > { %v1869_v59 = vpop.xlane.xlu1 %1868 }
 0x5bf   : > { %3276 = vrcp.f32 %v1869_v59 }
 0x5c2   : > { %v1872_v37 = vpop.xlane.xlu1 %1871 }
 0x5c3   : > { %v2271_v2 = vpop.xlane.xlu0 %2270  ;;  %3278 = vrcp.f32 %v1872_v37 }
 0x5c4   : > { %v3271_v41 = vpop.eup %3270  ;;  %3280 = vrcp.f32 %v2265_v12 }
 0x5c5   : > { %v1886_v9 = vmul.f32 %v3271_v41, %v4324_v49  ;;  %v3273_v15 = vpop.eup %3272  ;;  %3282 = vrcp.f32 %v1875_v58 }
 0x5c6   : > { %v1878_v62 = vpop.xlane.xlu1 %1877  ;;  %v1887_v54 = vmul.f32 %v3273_v15, %v4315_v42  ;;  %3284 = vrcp.f32 %v2268_v7 }
 0x5c7   : > { %v2295_v30 = vpop.permute.xlu0 %2294  ;;  %3018 = vmatmul.mubr.msk.f32.vlgmr.msra.gmra.mxu0 %vm989_vm7, %v1886_v9  ;;  %3286 = vrcp.f32 %v1878_v62 }
 0x5c8   : > { %3074 = vmatpush3.msk.msra.mxu0 %vm1109_vm6, %v4228_v27  ;;  %3120 = vmatpush3.msra.mxu1 %v2295_v30  ;;  %v3275_v49 = vpop.eup %3274  ;;  %3288 = vrcp.f32 %v2271_v2 }
 0x5c9   : > { %3075 = vmatprep.subr.mxu0 %v4594_v50  ;;  %3020 = vmatprep.mubr.msk.f32.mxu0 %vm3318_vm4, %v4594_v50  ;;  %v1888_v27 = vmul.f32 %v3275_v49, %v4331_v6  ;;  %3290 = vrcp.f32 %v2253_v56 }
 0x5ca   : > { %3076 = vmatpush3.msra.mxu0 %v4427_v61  ;;  %v2256_v19 = vpop.xlane.xlu1 %2255  ;;  %3114 = vmatprep.subr.mxu1 %v4594_v50 }
 0x5cb   : > { %3077 = vmatprep.subr.mxu0 %v4594_v50  ;;  %3021 = vmatmul.mubr.msk.f32.gmra.mxu0 %vm989_vm7, %v1887_v54  ;;  %3292 = vrcp.f32 %v2256_v19 }
 0x5cc   : > { %3078 = vmatpush3.msra.mxu0 %v4425_v4  ;;  %3023 = vmatprep.mubr.msk.f32.mxu0 %vm3318_vm4, %v4594_v50  ;;  %v3277_v42 = vpop.eup %3276 }
 0x5cd   : > { %3079 = vmatprep.subr.mxu0 %v4594_v50  ;;  %v1889_v47 = vmul.f32 %v3277_v42, %v4341_v35 }
 0x5ce   : > { %3080 = vmatpush3.msra.mxu0 %v4437_v48  ;;  %v2259_v53 = vpop.xlane.xlu1 %2258 }
 0x5cf   : > { %3081 = vmatprep.subr.mxu0 %v4594_v50  ;;  %3024 = vmatmul.mubr.msk.f32.gmra.mxu0 %vm989_vm7, %v1888_v27  ;;  %3294 = vrcp.f32 %v2259_v53 }
 0x5d0   : > { %3082 = vmatpush3.msra.mxu0 %v4450_v13  ;;  %3026 = vmatprep.mubr.msk.f32.mxu0 %vm3318_vm4, %v4594_v50  ;;  %v3279_v6 = vpop.eup %3278 }
 0x5d1   : > { %3083 = vmatprep.subr.mxu0 %v4594_v50  ;;  %v3281_v33 = vpop.eup %3280  ;;  %v1890_v29 = vmul.f32 %v3279_v6, %v4350_v60 }
 0x5d2   : > { %3084 = vmatpush3.msra.mxu0 %v2295_v30  ;;  %v2262_v55 = vpop.xlane.xlu1 %2261  ;;  %v3283_v38 = vpop.eup %3282  ;;  %v2283_v52 = vmul.f32 %v3281_v33, %v4337_v18 }
 0x5d3   : > { %3027 = vmatmul.mubr.msk.f32.gmra.mxu0 %vm989_vm7, %v1889_v47  ;;  %3085 = vmatprep.subr.mxu0 %v4594_v50  ;;  %v3285_v32 = vpop.eup %3284  ;;  %v1891_v35 = vmul.f32 %v3283_v38, %v4321_v28  ;;  %3296 = vrcp.f32 %v2262_v55 }
 0x5d4   : > { %3029 = vmatprep.mubr.msk.f32.mxu0 %vm3318_vm4, %v4594_v50  ;;  %v3287_v60 = vpop.eup %3286  ;;  %v2284_v18 = vmul.f32 %v3285_v32, %v4347_v24 }
 0x5d5   : > { %v3289_v21 = vpop.eup %3288  ;;  %v1892_v14 = vmul.f32 %v3287_v60, %v4366_v36 }
 0x5d6   : > { %v2293_v39 = vpop.permute.xlu1 %2292  ;;  %v3291_v28 = vpop.eup %3290  ;;  %v2285_v51 = vmul.f32 %v3289_v21, %v4359_v8 }
 0x5d7   : > { %3030 = vmatmul.mubr.msk.f32.gmra.mxu0 %vm989_vm7, %v1890_v29  ;;  %3121 = vmatpush3.msra.mxu1 %v2293_v39  ;;  %v2279_v24 = vmul.f32 %v3291_v28, %v4328_v46 }
 0x5d8   : > { %3086 = vmatpush3.msra.mxu0 %v2293_v39  ;;  %3100 = vmatmul.mubr.msk.f32.vlgmr.msra.gmra.mxu1 %vm989_vm7, %v2283_v52  ;;  %v3293_v31 = vpop.eup %3292 }
 0x5d9   : > { %3032 = vmatprep.mubr.msk.f32.mxu0 %vm3318_vm4, %v4594_v50  ;;  %3102 = vmatprep.mubr.msk.f32.mxu1 %vm3318_vm4, %v4594_v50  ;;  %v2280_v36 = vmul.f32 %v3293_v31, %v4380_v16  ;;  %v3298_v31 = vld [vmem:[%s3363_s20 + $0x20] sm:$0xff] }
 0x5db   : > { %3033 = vmatmul.mubr.msk.f32.gmra.mxu0 %vm989_vm7, %v1891_v35 }
 0x5dc   : > { %3103 = vmatmul.mubr.msk.f32.gmra.mxu1 %vm989_vm7, %v2284_v18  ;;  %3035 = vmatprep.mubr.msk.f32.mxu0 %vm3318_vm4, %v4594_v50  ;;  %v3295_v26 = vpop.eup %3294 }
 0x5dd   : > { %3105 = vmatprep.mubr.msk.f32.mxu1 %vm3318_vm4, %v4594_v50  ;;  %v2281_v8 = vmul.f32 %v3295_v26, %v4392_v44 }
 0x5df   : > { %3036 = vmatmul.mubr.msk.f32.gmra.mxu0 %vm989_vm7, %v1892_v14 }
 0x5e0   : > { %3106 = vmatmul.mubr.msk.f32.gmra.mxu1 %vm989_vm7, %v2285_v51  ;;  %3087 = vmatprep.mubr.msk.f32.mxu0 %vm3318_vm4, %v4594_v50  ;;  %v3297_v40 = vpop.eup %3296 }
 0x5e1   : > { %v2282_v46 = vmul.f32 %v3297_v40, %v4403_v3 }
 0x5e3   : > { %3088 = vmatmul.mubr.msk.f32.vlgmr.msra.gmra.mxu0 %vm989_vm7, %v2279_v24 }
 0x5e4   : > { %3090 = vmatprep.mubr.msk.f32.mxu0 %vm3318_vm4, %v4594_v50 }
 0x5e7   : > { %3091 = vmatmul.mubr.msk.f32.gmra.mxu0 %vm989_vm7, %v2280_v36 }
 0x5e8   : > { %3093 = vmatprep.mubr.msk.f32.mxu0 %vm3318_vm4, %v4594_v50 }
 0x5eb   : > { %3094 = vmatmul.mubr.msk.f32.gmra.mxu0 %vm989_vm7, %v2281_v8 }
 0x5ec   : > { %3096 = vmatprep.mubr.msk.f32.mxu0 %vm3318_vm4, %v4594_v50  ;;  %v2555_v50 = vld [vmem:[%s4590_s3 + $0x3] ss:$0 sm:$0xff] }
 0x5ef   : > { %3097 = vmatmul.mubr.msk.f32.gmra.mxu0 %vm989_vm7, %v2282_v46 }
 0x5f4   : > { %v1178_v4 = vpop.f32.mrf.mxu0 }
 0x5f5   : > { %v1212_v20 = vadd.f32 %v2555_v50, %v1178_v4 }
 0x5f6   : > { %v2879_v16 = vpop.f32.mrf.mxu0 }
 0x5f8   : > { %v1183_v61 = vpop.f32.mrf.mxu0 }
 0x5f9   : > { %v1213_v43 = vadd.f32 %v2555_v50, %v1183_v61  ;;  %v3299_v61 = vld [vmem:[%s3363_s20 + $0x28] sm:$0xff] }
 0x5fa   : > { %v2882_v0 = vpop.f32.mrf.mxu0 }
 0x5fc   : > { %v1188_v48 = vpop.f32.mrf.mxu0 }
 0x5fd   : > { %v1214_v56 = vadd.f32 %v2555_v50, %v1188_v48 }
 0x5fe   : > { %v2885_v5 = vpop.f32.mrf.mxu0 }
 0x600   : > { %v1193_v23 = vpop.f32.mrf.mxu0 }
 0x601   : > { %v1215_v7 = vadd.f32 %v2555_v50, %v1193_v23 }
 0x602   : > { %v2888_v13 = vpop.f32.mrf.mxu0 }
 0x604   : > { %v1198_v1 = vpop.f32.mrf.mxu0 }
 0x605   : > { %v1216_v9 = vadd.f32 %v2555_v50, %v1198_v1 }
 0x606   : > { %v2891_v44 = vpop.f32.mrf.mxu0 }
 0x608   : > { %v1203_v11 = vpop.f32.mrf.mxu0 }
 0x609   : > { %v1217_v54 = vadd.f32 %v2555_v50, %v1203_v11 }
 0x60a   : > { %v2894_v10 = vpop.f32.mrf.mxu0 }
 0x60b   : > { %v3300_v10 = vld [vmem:[%s3363_s20 + $0x30] sm:$0x3] }
 0x639   : > { %v1208_v25 = vpop.f32.mrf.mxu0 }
 0x63a   : > { %v1218_v42 = vadd.f32 %v2555_v50, %v1208_v25 }
 0x63b   : > { %v2897_v3 = vpop.f32.mrf.mxu0 }
 0x63e   : > { %v1590_v63 = vpop.f32.mrf.mxu0 }
 0x63f   : > { %v1624_v45 = vadd.f32 %v1590_v63, %v1212_v20  ;;  %v3301_v63 = vld [vmem:[%s3363_s20] sm:$0xff] }
 0x640   : > { %v2949_v22 = vpop.f32.mrf.mxu0 }
 0x642   : > { %v1595_v34 = vpop.f32.mrf.mxu0 }
 0x643   : > { %v1625_v58 = vadd.f32 %v1595_v34, %v1213_v43 }
 0x644   : > { %v2952_v57 = vpop.f32.mrf.mxu0 }
 0x647   : > { %v1600_v17 = vpop.f32.mrf.mxu0 }
 0x648   : > { %v4551_v12 = vadd.f32 %v1600_v17, %v1214_v56  ;;  %v3302_v56 = vld [vmem:[%s3363_s20 + $0x8] sm:$0xff] }
 0x649   : > { %v2955_v59 = vpop.f32.mrf.mxu0 }
 0x64b   : > { %v1605_v37 = vpop.f32.mrf.mxu0 }
 0x64c   : > { %v4553_v2 = vadd.f32 %v1605_v37, %v1215_v7 }
 0x64d   : > { %v2958_v41 = vpop.f32.mrf.mxu0 }
 0x64e   : > { %v3303_v41 = vld [vmem:[%s3363_s20 + $0x10] sm:$0xff] }
 0x64f   : > { %v1610_v15 = vpop.f32.mrf.mxu0 }
 0x650   : > { %v1628_v62 = vadd.f32 %v1610_v15, %v1216_v9 }
 0x651   : > { %v2961_v30 = vpop.f32.mrf.mxu0 }
 0x653   : > { %v1615_v49 = vpop.f32.mrf.mxu0 }
 0x654   : > { %v1629_v19 = vadd.f32 %v1615_v49, %v1217_v54  ;;  %v3304_v54 = vld [vmem:[%s3363_s20 + $0x18] sm:$0xff] }
 0x655   : > { %v2964_v27 = vpop.f32.mrf.mxu0 }
 0x657   : > { %v1620_v53 = vpop.f32.mrf.mxu0 }
 0x658   : > { %v1630_v47 = vadd.f32 %v1620_v53, %v1218_v42 }
 0x659   : > { %v2967_v6 = vpop.f32.mrf.mxu0 }
 0x687   : > { %v1983_v55 = vpop.f32.mrf.mxu0 }
 0x688   : > { %v2017_v13 = vadd.f32 %v1983_v55, %v1624_v45 }
 0x689   : > { %v3019_v33 = vpop.f32.mrf.mxu0 }
 0x68b   : > { %v1988_v29 = vpop.f32.mrf.mxu0 }
 0x68c   : > { %v2018_v20 = vadd.f32 %v1988_v29, %v1625_v58 }
 0x68d   : > { %v3022_v38 = vpop.f32.mrf.mxu0 }
 0x68f   : > { %v1993_v52 = vpop.f32.mrf.mxu0 }
 0x690   : > { %v2019_v57 = vadd.f32 %v1993_v52, %v4551_v12 }
 0x691   : > { %v3025_v39 = vpop.f32.mrf.mxu0 }
 0x693   : > { %v1998_v32 = vpop.f32.mrf.mxu0 }
 0x694   : > { %v2020_v37 = vadd.f32 %v1998_v32, %v4553_v2 }
 0x695   : > { %v3028_v35 = vpop.f32.mrf.mxu0 }
 0x697   : > { %v2003_v60 = vpop.f32.mrf.mxu0 }
 0x698   : > { %v2021_v18 = vadd.f32 %v2003_v60, %v1628_v62  ;;  %v2421_v21 = vpop.f32.mrf.mxu1 }
 0x699   : > { %v3031_v14 = vpop.f32.mrf.mxu0 }
 0x69a   : > { %v2439_v28 = vadd.f32 %v2421_v21, %v2021_v18  ;;  %v3101_v51 = vpop.f32.mrf.mxu1 }
 0x69b   : > { %v2008_v24 = vpop.f32.mrf.mxu0 }
 0x69c   : > { %v2446_v36 = vadd.f32 %v3298_v31, %v2439_v28  ;;  %v2022_v26 = vadd.f32 %v2008_v24, %v1629_v19  ;;  %v2426_v8 = vpop.f32.mrf.mxu1 }
 0x69d   : > { %v3034_v40 = vpop.f32.mrf.mxu0 }
 0x69e   : > { %2453 = vst.msk [vmem:[%s4559_s24 + $0x20] sm:$0xff] %vm230_vm0, %v2446_v36  ;;  %v2440_v46 = vadd.f32 %v2426_v8, %v2022_v26  ;;  %v3104_v4 = vpop.f32.mrf.mxu1 }
 0x69f   : > { %v2013_v16 = vpop.f32.mrf.mxu0 }
 0x6a0   : > { %v2447_v0 = vadd.f32 %v3299_v61, %v2440_v46  ;;  %v2023_v48 = vadd.f32 %v2013_v16, %v1630_v47  ;;  %v2431_v5 = vpop.f32.mrf.mxu1 }
 0x6a1   : > { %v3037_v23 = vpop.f32.mrf.mxu0 }
 0x6a2   : > { %2454 = vst.msk [vmem:[%s4559_s24 + $0x28] sm:$0xff] %vm230_vm0, %v2447_v0  ;;  %v2441_v1 = vadd.f32 %v2431_v5, %v2023_v48  ;;  %v3107_v44 = vpop.f32.mrf.mxu1 }
 0x6a3   : > { %v2401_v11 = vpop.f32.mrf.mxu0 }
 0x6a4   : > { %v2448_v25 = vadd.f32 %v3300_v10, %v2441_v1  ;;  %v2435_v50 = vadd.f32 %v2401_v11, %v2017_v13 }
 0x6a5   : > { %v3089_v3 = vpop.f32.mrf.mxu0 }
 0x6a6   : > { %2455 = vst.msk [vmem:[%s4559_s24 + $0x30] sm:$0x3] %vm249_vm1, %v2448_v25  ;;  %v2442_v22 = vadd.f32 %v3301_v63, %v2435_v50 }
 0x6a7   : > { %v2406_v43 = vpop.f32.mrf.mxu0 }
 0x6a8   : > { %2449 = vst.msk [vmem:[%s4559_s24] sm:$0xff] %vm230_vm0, %v2442_v22  ;;  %v2436_v45 = vadd.f32 %v2406_v43, %v2018_v20 }
 0x6a9   : > { %v3092_v34 = vpop.f32.mrf.mxu0 }
 0x6aa   : > { %v2443_v17 = vadd.f32 %v3302_v56, %v2436_v45 }
 0x6ab   : > { %v2411_v59 = vpop.f32.mrf.mxu0 }
 0x6ac   : > { %2450 = vst.msk [vmem:[%s4559_s24 + $0x8] sm:$0xff] %vm230_vm0, %v2443_v17  ;;  %v2437_v58 = vadd.f32 %v2411_v59, %v2019_v57 }
 0x6ad   : > { %v3095_v7 = vpop.f32.mrf.mxu0 }
 0x6ae   : > { %v2444_v9 = vadd.f32 %v3303_v41, %v2437_v58 }
 0x6af   : > { %v2416_v15 = vpop.f32.mrf.mxu0 }
 0x6b0   : > { %2451 = vst.msk [vmem:[%s4559_s24 + $0x10] sm:$0xff] %vm230_vm0, %v2444_v9  ;;  %v2438_v62 = vadd.f32 %v2416_v15, %v2020_v37 }
 0x6b1   : > { %v3098_v30 = vpop.f32.mrf.mxu0 }
 0x6b2   : > { %v2445_v49 = vadd.f32 %v3304_v54, %v2438_v62 }
 0x6b4   : > { %2452 = vst.msk [vmem:[%s4559_s24 + $0x18] sm:$0xff] %vm230_vm0, %v2445_v49 }
 0x6b5 PF: > { %s14_s15 = sadd.s32 1, %s3311_s15  }
 0x6b6   : > { %p11_p4 = scmp.ge.s32.totalorder %s14_s15, 4  }
 0x6b8   :  { %13 = sbr.rel (!%p11_p4) target bundleno = 1 (0x1), region = 75 }

</bundles_post_ra>
